<compile_context>
chip_gen: v5e
topology: v5e:2x2
jax: 0.10.0
libtpu: 0.0.40
codegen_flags: <defaults>
</compile_context>

<pallas_src>
import jax
import jax.numpy as jnp
from jax.experimental import pallas as pl
from jax.experimental.pallas import tpu as pltpu


def _leaky_relu(v, slope=0.01):
    # max(v, slope*v) == leaky_relu(v) for slope in (0,1); 2 VALU ops vs 3.
    return jnp.maximum(v, slope * v)


def net4_kernel(x_ref, w1_ref, b1_ref, w2_ref, b2_ref, w3_ref, b3_ref,
                w4t_ref, b4_ref, o_ref):
    # fc1 + LeakyReLU (bf16 MXU operands, f32 accumulation; elementwise in f32).
    # x arrives f32; cast to bf16 here (cheap VPU work) instead of in the wrapper.
    x = x_ref[...].astype(jnp.bfloat16)
    h = jnp.dot(x, w1_ref[...], preferred_element_type=jnp.float32)
    h = _leaky_relu(h + b1_ref[...])                      # (block_b, 128)
    # fc2 + LeakyReLU
    h = jnp.dot(h.astype(jnp.bfloat16), w2_ref[...],
                preferred_element_type=jnp.float32)
    h = _leaky_relu(h + b2_ref[...])                      # (block_b, 128)
    # fc3 + LeakyReLU
    h = jnp.dot(h.astype(jnp.bfloat16), w3_ref[...],
                preferred_element_type=jnp.float32)
    h = _leaky_relu(h + b3_ref[...])                      # (block_b, 128)
    # fc4 + LeakyReLU, computed transposed so the stored tile is lane-dense:
    #   yT[r, b] = sum_k w4t[r, k] * h[b, k]   (only row 0 of w4t is real data)
    y_t = jax.lax.dot_general(
        w4t_ref[...], h.astype(jnp.bfloat16),
        dimension_numbers=(((1,), (1,)), ((), ())),
        preferred_element_type=jnp.float32)               # (8, block_b)
    y_t = _leaky_relu(y_t[0:1, :] + b4_ref[0, 0])         # (1, block_b)
    o_ref[...] = y_t.reshape(o_ref.shape)                 # (1, 1, block_b)


def _round_up(v, m):
    return ((v + m - 1) // m) * m


def net4_forward(x, w1, b1, w2, b2, w3, b3, w4, b4, *, block_b=2048):
    """Fused Net_4 forward.

    x  : (B, n) float32
    w_i: (in, out) float32 (transposed PyTorch layout), b_i: (out,) float32
    returns (B, 1) float32
    """
    B, N = x.shape
    H1, H2, H3, O = w1.shape[1], w2.shape[1], w3.shape[1], w4.shape[1]
    assert O == 1

    # ---- one-time parameter prep (outside the kernel) ----------------------
    LANE = 128
    H1p, H2p, H3p = _round_up(H1, LANE), _round_up(H2, LANE), _round_up(H3, LANE)

    def pad2(a, r, c):
        return jnp.pad(a, ((0, r - a.shape[0]), (0, c - a.shape[1])))

    w1p = pad2(w1, N, H1p).astype(jnp.bfloat16)                    # (N, 128)
    w2p = pad2(w2, H1p, H2p).astype(jnp.bfloat16)                  # (128, 128)
    w3p = pad2(w3, H2p, H3p).astype(jnp.bfloat16)                  # (128, 128)
    # fc4 weight stored transposed, sublane-padded to 8 rows (row 0 is real).
    w4tp = pad2(w4.T, 8, H3p).astype(jnp.bfloat16)                 # (8, 128)
    b1p = jnp.pad(b1, (0, H1p - H1)).reshape(1, H1p).astype(jnp.float32)
    b2p = jnp.pad(b2, (0, H2p - H2)).reshape(1, H2p).astype(jnp.float32)
    b3p = jnp.pad(b3, (0, H3p - H3)).reshape(1, H3p).astype(jnp.float32)
    b4s = b4.reshape(1, 1).astype(jnp.float32)                     # scalar -> SMEM

    # ---- batch tile selection ----------------------------------------------
    B128 = _round_up(B, LANE)
    bb = _round_up(max(LANE, min(block_b, B128)), LANE)
    # Guarantee >= 2 grid steps when B allows it, so the "parallel" batch axis
    # shards across both TensorCores on v7x (and pipelines the x stream).
    if B128 >= 2 * LANE:
        bb = min(bb, max(LANE, (B128 // 2) // LANE * LANE))
    bb = min(bb, 4096)
    Bp = _round_up(B, bb)
    grid = (Bp // bb,)
    xp = jnp.pad(x, ((0, Bp - B), (0, 0)))    # stays f32; kernel casts to bf16

    # ---- VMEM budget: only raise the scoped limit when we'd trip v5e's 16 MiB
    # default (double-buffered x tile + live (bb,128) f32 intermediates + weights).
    est_vmem = 2 * bb * N * 4 + 2 * bb * 8 + 10 * bb * LANE * 4 + (1 << 19)
    cp_kwargs = dict(dimension_semantics=("parallel",))
    if est_vmem > 12 * 1024 * 1024:
        cp_kwargs["vmem_limit_bytes"] = int(min(est_vmem * 3 // 2, 48 * 1024 * 1024))

    out = pl.pallas_call(
        net4_kernel,
        out_shape=jax.ShapeDtypeStruct((grid[0], 1, bb), jnp.float32),
        grid_spec=pltpu.PrefetchScalarGridSpec(
            num_scalar_prefetch=0,
            grid=grid,
            in_specs=[
                pl.BlockSpec((bb, N), lambda i: (i, 0)),           # x tile (streamed)
                pl.BlockSpec((N, H1p), lambda i: (0, 0)),          # W1 (resident)
                pl.BlockSpec((1, H1p), lambda i: (0, 0)),          # b1
                pl.BlockSpec((H1p, H2p), lambda i: (0, 0)),        # W2
                pl.BlockSpec((1, H2p), lambda i: (0, 0)),          # b2
                pl.BlockSpec((H2p, H3p), lambda i: (0, 0)),        # W3
                pl.BlockSpec((1, H3p), lambda i: (0, 0)),          # b3
                pl.BlockSpec((8, H3p), lambda i: (0, 0)),          # W4^T (row 0 real)
                pl.BlockSpec(memory_space=pltpu.MemorySpace.SMEM), # b4 scalar
            ],
            out_specs=pl.BlockSpec((1, 1, bb), lambda i: (i, 0, 0)),
        ),
        compiler_params=pltpu.CompilerParams(**cp_kwargs),
    )(xp, w1p, b1p, w2p, b2p, w3p, b3p, w4tp, b4s)

    # (num_tiles, 1, bb) -> (B, 1); tiling preserves row order, padded rows dropped.
    return out.reshape(-1)[:B].reshape(B, 1)


if __name__ == "__main__":
    key = jax.random.PRNGKey(0)
    # Net_4(n=32); B chosen not to be a multiple of 128 to exercise padding,
    # and large enough to produce a multi-step ("parallel") grid.
    B, N = 1000, 32
    H1, H2, H3, O = 100, 50, 50, 1

    keys = jax.random.split(key, 9)
    x = jax.random.normal(keys[0], (B, N), dtype=jnp.float32)

    def linear_init(kw, kb, fan_in, fan_out):
        bound = 1.0 / jnp.sqrt(fan_in)
        w = jax.random.uniform(kw, (fan_in, fan_out), jnp.float32, -bound, bound)
        b = jax.random.uniform(kb, (fan_out,), jnp.float32, -bound, bound)
        return w, b

    w1, b1 = linear_init(keys[1], keys[2], N, H1)
    w2, b2 = linear_init(keys[3], keys[4], H1, H2)
    w3, b3 = linear_init(keys[5], keys[6], H2, H3)
    w4, b4 = linear_init(keys[7], keys[8], H3, O)

    out = net4_forward(x, w1, b1, w2, b2, w3, b3, w4, b4)
    out = jax.block_until_ready(out)

    # Reference applying the same bf16 operand quantization the kernel uses
    # (matmul operands bf16, accumulation + elementwise in f32).
    def bf(a):
        return a.astype(jnp.bfloat16).astype(jnp.float32)

    def lrelu(v):
        return jnp.where(v >= 0, v, 0.01 * v)

    h = lrelu(bf(x) @ bf(w1) + b1)
    h = lrelu(bf(h) @ bf(w2) + b2)
    h = lrelu(bf(h) @ bf(w3) + b3)
    ref = lrelu(bf(h) @ bf(w4) + b4)

    assert out.shape == (B, O)
    assert jnp.allclose(out, ref, atol=1e-3, rtol=1e-3), float(
        jnp.max(jnp.abs(out - ref)))

    print("KERNEL_OK")
</pallas_src>

<mosaic_0001>
module attributes {stable_mosaic.version = 11 : i64} {
  func.func @net4_kernel(%arg0: i32, %arg1: memref<512x32xf32, #tpu.memory_space<vmem>>, %arg2: memref<32x128xbf16, #tpu.memory_space<vmem>>, %arg3: memref<1x128xf32, #tpu.memory_space<vmem>>, %arg4: memref<128x128xbf16, #tpu.memory_space<vmem>>, %arg5: memref<1x128xf32, #tpu.memory_space<vmem>>, %arg6: memref<128x128xbf16, #tpu.memory_space<vmem>>, %arg7: memref<1x128xf32, #tpu.memory_space<vmem>>, %arg8: memref<8x128xbf16, #tpu.memory_space<vmem>>, %arg9: memref<1x1xf32, #tpu.memory_space<smem>>, %arg10: memref<1x1x512xf32, #tpu.memory_space<vmem>>) attributes {dimension_semantics = [#tpu.dimension_semantics<parallel>], iteration_bounds = array<i64: 2>, scalar_prefetch = 0 : i64, scratch_operands = 0 : i64, tpu.core_type = #tpu.core_type<tc>, window_params = [{transform_indices = @transform_0, window_bounds = array<i64: 512, 32>}, {pipeline_mode = #tpu.pipeline_mode<synchronous>, transform_indices = @transform_1, window_bounds = array<i64: 32, 128>}, {pipeline_mode = #tpu.pipeline_mode<synchronous>, transform_indices = @transform_2, window_bounds = array<i64: 1, 128>}, {pipeline_mode = #tpu.pipeline_mode<synchronous>, transform_indices = @transform_3, window_bounds = array<i64: 128, 128>}, {pipeline_mode = #tpu.pipeline_mode<synchronous>, transform_indices = @transform_4, window_bounds = array<i64: 1, 128>}, {pipeline_mode = #tpu.pipeline_mode<synchronous>, transform_indices = @transform_5, window_bounds = array<i64: 128, 128>}, {pipeline_mode = #tpu.pipeline_mode<synchronous>, transform_indices = @transform_6, window_bounds = array<i64: 1, 128>}, {pipeline_mode = #tpu.pipeline_mode<synchronous>, transform_indices = @transform_7, window_bounds = array<i64: 8, 128>}, {transform_indices = @transform_8, window_bounds = array<i64: 1, 1>}, {transform_indices = @transform_9, window_bounds = array<i64: 1, 1, 512>}]} {
    %c0 = arith.constant 0 : index
    %c0_0 = arith.constant 0 : index
    %0 = vector.load %arg1[%c0, %c0_0] : memref<512x32xf32, #tpu.memory_space<vmem>>, vector<512x32xf32>
    %1 = arith.truncf %0 : vector<512x32xf32> to vector<512x32xbf16>
    %c0_1 = arith.constant 0 : index
    %c0_2 = arith.constant 0 : index
    %2 = vector.load %arg2[%c0_1, %c0_2] : memref<32x128xbf16, #tpu.memory_space<vmem>>, vector<32x128xbf16>
    %cst = arith.constant dense<0.000000e+00> : vector<512x128xf32>
    %3 = tpu.matmul %1, %2, %cst {dimension_numbers = #tpu.dot_dimension_numbers<[1], [0], [0], [1], [0, 0, 1, 1], [], []>} : vector<512x32xbf16>, vector<32x128xbf16>, vector<512x128xf32> -> vector<512x128xf32>
    %c0_3 = arith.constant 0 : index
    %c0_4 = arith.constant 0 : index
    %4 = vector.load %arg3[%c0_3, %c0_4] : memref<1x128xf32, #tpu.memory_space<vmem>>, vector<1x128xf32>
    %5 = vector.broadcast %4 : vector<1x128xf32> to vector<512x128xf32>
    %6 = arith.addf %3, %5 : vector<512x128xf32>
    %cst_5 = arith.constant 0.00999999977 : f32
    %7 = vector.broadcast %cst_5 : f32 to vector<512x128xf32>
    %8 = arith.mulf %7, %6 : vector<512x128xf32>
    %9 = arith.maximumf %6, %8 : vector<512x128xf32>
    %10 = arith.truncf %9 : vector<512x128xf32> to vector<512x128xbf16>
    %c0_6 = arith.constant 0 : index
    %c0_7 = arith.constant 0 : index
    %11 = vector.load %arg4[%c0_6, %c0_7] : memref<128x128xbf16, #tpu.memory_space<vmem>>, vector<128x128xbf16>
    %cst_8 = arith.constant dense<0.000000e+00> : vector<512x128xf32>
    %12 = tpu.matmul %10, %11, %cst_8 {dimension_numbers = #tpu.dot_dimension_numbers<[1], [0], [0], [1], [0, 0, 1, 1], [], []>} : vector<512x128xbf16>, vector<128x128xbf16>, vector<512x128xf32> -> vector<512x128xf32>
    %c0_9 = arith.constant 0 : index
    %c0_10 = arith.constant 0 : index
    %13 = vector.load %arg5[%c0_9, %c0_10] : memref<1x128xf32, #tpu.memory_space<vmem>>, vector<1x128xf32>
    %14 = vector.broadcast %13 : vector<1x128xf32> to vector<512x128xf32>
    %15 = arith.addf %12, %14 : vector<512x128xf32>
    %cst_11 = arith.constant 0.00999999977 : f32
    %16 = vector.broadcast %cst_11 : f32 to vector<512x128xf32>
    %17 = arith.mulf %16, %15 : vector<512x128xf32>
    %18 = arith.maximumf %15, %17 : vector<512x128xf32>
    %19 = arith.truncf %18 : vector<512x128xf32> to vector<512x128xbf16>
    %c0_12 = arith.constant 0 : index
    %c0_13 = arith.constant 0 : index
    %20 = vector.load %arg6[%c0_12, %c0_13] : memref<128x128xbf16, #tpu.memory_space<vmem>>, vector<128x128xbf16>
    %cst_14 = arith.constant dense<0.000000e+00> : vector<512x128xf32>
    %21 = tpu.matmul %19, %20, %cst_14 {dimension_numbers = #tpu.dot_dimension_numbers<[1], [0], [0], [1], [0, 0, 1, 1], [], []>} : vector<512x128xbf16>, vector<128x128xbf16>, vector<512x128xf32> -> vector<512x128xf32>
    %c0_15 = arith.constant 0 : index
    %c0_16 = arith.constant 0 : index
    %22 = vector.load %arg7[%c0_15, %c0_16] : memref<1x128xf32, #tpu.memory_space<vmem>>, vector<1x128xf32>
    %23 = vector.broadcast %22 : vector<1x128xf32> to vector<512x128xf32>
    %24 = arith.addf %21, %23 : vector<512x128xf32>
    %cst_17 = arith.constant 0.00999999977 : f32
    %25 = vector.broadcast %cst_17 : f32 to vector<512x128xf32>
    %26 = arith.mulf %25, %24 : vector<512x128xf32>
    %27 = arith.maximumf %24, %26 : vector<512x128xf32>
    %c0_18 = arith.constant 0 : index
    %c0_19 = arith.constant 0 : index
    %28 = vector.load %arg8[%c0_18, %c0_19] : memref<8x128xbf16, #tpu.memory_space<vmem>>, vector<8x128xbf16>
    %29 = arith.truncf %27 : vector<512x128xf32> to vector<512x128xbf16>
    %cst_20 = arith.constant dense<0.000000e+00> : vector<8x512xf32>
    %30 = tpu.matmul %28, %29, %cst_20 {dimension_numbers = #tpu.dot_dimension_numbers<[1], [1], [0], [0], [0, 0, 1, 0], [], []>} : vector<8x128xbf16>, vector<512x128xbf16>, vector<8x512xf32> -> vector<8x512xf32>
    %31 = vector.extract_strided_slice %30 {offsets = [0, 0], sizes = [1, 512], strides = [1, 1]} : vector<8x512xf32> to vector<1x512xf32>
    %c0_21 = arith.constant 0 : index
    %c0_22 = arith.constant 0 : index
    %32 = memref.load %arg9[%c0_21, %c0_22] : memref<1x1xf32, #tpu.memory_space<smem>>
    %33 = vector.broadcast %32 : f32 to vector<1x512xf32>
    %34 = arith.addf %31, %33 : vector<1x512xf32>
    %cst_23 = arith.constant 0.00999999977 : f32
    %35 = vector.broadcast %cst_23 : f32 to vector<1x512xf32>
    %36 = arith.mulf %35, %34 : vector<1x512xf32>
    %37 = arith.maximumf %34, %36 : vector<1x512xf32>
    %38 = vector.shape_cast %37 : vector<1x512xf32> to vector<1x1x512xf32>
    %c0_24 = arith.constant 0 : index
    %c0_25 = arith.constant 0 : index
    %c0_26 = arith.constant 0 : index
    %39 = vector.load %arg10[%c0_24, %c0_25, %c0_26] : memref<1x1x512xf32, #tpu.memory_space<vmem>>, vector<1x1x512xf32>
    tpu.vector_store %arg10[%c0_24, %c0_25, %c0_26], %38 {strides = array<i32>} : memref<1x1x512xf32, #tpu.memory_space<vmem>>, vector<1x1x512xf32>,
    return
  }
  func.func @transform_0(%arg0: i32) -> (i32, i32) {
    %c0_i32 = arith.constant 0 : i32
    %c0_i32_0 = arith.constant 0 : i32
    return %arg0, %c0_i32 : i32, i32
  }
  func.func @transform_1(%arg0: i32) -> (i32, i32) {
    %c0_i32 = arith.constant 0 : i32
    %c0_i32_0 = arith.constant 0 : i32
    %c0_i32_1 = arith.constant 0 : i32
    return %c0_i32, %c0_i32_0 : i32, i32
  }
  func.func @transform_2(%arg0: i32) -> (i32, i32) {
    %c0_i32 = arith.constant 0 : i32
    %c0_i32_0 = arith.constant 0 : i32
    %c0_i32_1 = arith.constant 0 : i32
    return %c0_i32, %c0_i32_0 : i32, i32
  }
  func.func @transform_3(%arg0: i32) -> (i32, i32) {
    %c0_i32 = arith.constant 0 : i32
    %c0_i32_0 = arith.constant 0 : i32
    %c0_i32_1 = arith.constant 0 : i32
    return %c0_i32, %c0_i32_0 : i32, i32
  }
  func.func @transform_4(%arg0: i32) -> (i32, i32) {
    %c0_i32 = arith.constant 0 : i32
    %c0_i32_0 = arith.constant 0 : i32
    %c0_i32_1 = arith.constant 0 : i32
    return %c0_i32, %c0_i32_0 : i32, i32
  }
  func.func @transform_5(%arg0: i32) -> (i32, i32) {
    %c0_i32 = arith.constant 0 : i32
    %c0_i32_0 = arith.constant 0 : i32
    %c0_i32_1 = arith.constant 0 : i32
    return %c0_i32, %c0_i32_0 : i32, i32
  }
  func.func @transform_6(%arg0: i32) -> (i32, i32) {
    %c0_i32 = arith.constant 0 : i32
    %c0_i32_0 = arith.constant 0 : i32
    %c0_i32_1 = arith.constant 0 : i32
    return %c0_i32, %c0_i32_0 : i32, i32
  }
  func.func @transform_7(%arg0: i32) -> (i32, i32) {
    %c0_i32 = arith.constant 0 : i32
    %c0_i32_0 = arith.constant 0 : i32
    %c0_i32_1 = arith.constant 0 : i32
    return %c0_i32, %c0_i32_0 : i32, i32
  }
  func.func @transform_8(%arg0: i32) -> (i32, i32) {
    %c0_i32 = arith.constant 0 : i32
    %c0_i32_0 = arith.constant 0 : i32
    %c0_i32_1 = arith.constant 0 : i32
    return %c0_i32, %c0_i32_0 : i32, i32
  }
  func.func @transform_9(%arg0: i32) -> (i32, i32, i32) {
    %c0_i32 = arith.constant 0 : i32
    %c0_i32_0 = arith.constant 0 : i32
    %c0_i32_1 = arith.constant 0 : i32
    return %arg0, %c0_i32, %c0_i32_0 : i32, i32, i32
  }
}

</mosaic_0001>

<bundles_post_ra>
// kernel: tpu_custom_call.1
= control target key start
LH: loop header
LB: loop body
LE: loop exit
PB: predicated region body
PF: predicated region fallthrough
CT: control target
= control target key end

     0   :  { %s2704_s0 = inlined_call_operand.vmem [shape: f32[1024,32], index: 0, kind: input, shape index: {}]   ;;  %s2705_s1 = inlined_call_operand.vmem [shape: bf16[32,128], index: 1, kind: input, shape index: {}]   ;;  %s2706_s2 = inlined_call_operand.vmem [shape: f32[1,128], index: 2, kind: input, shape index: {}]   ;;  %s2707_s3 = inlined_call_operand.vmem [shape: bf16[128,128], index: 3, kind: input, shape index: {}]   ;;  %s2708_s4 = inlined_call_operand.vmem [shape: f32[1,128], index: 4, kind: input, shape index: {}]   ;;  %s2709_s5 = inlined_call_operand.vmem [shape: bf16[128,128], index: 5, kind: input, shape index: {}]   ;;  %s2710_s6 = inlined_call_operand.vmem [shape: f32[1,128], index: 6, kind: input, shape index: {}]   ;;  %s2711_s7 = inlined_call_operand.vmem [shape: bf16[8,128], index: 7, kind: input, shape index: {}]   ;;  %s2712_s8 = inlined_call_operand.<no memory space> [shape: f32[1,1], index: 8, kind: input, shape index: {}]   ;;  %s2713_s9 = inlined_call_operand.hbm [shape: f32[2,1,512], index: 9, kind: output, shape index: {}]  }
   0x1   :  { %14 = sst [smem:[#allocation2]] %s2712_s8 }
   0x2   :  { %15 = vsyncpa [#allocation4], 0 }
   0x3   :  { %17 = vsyncpa [#allocation4 + $0x1], 0  ;;  %s2145_s11 = smov 0   ;;  %s2147_s12 = smov 0  }
   0x4   :  { %s2149_s13 = smov 0   ;;  %s2151_s14 = smov 0  }
   0x5 LB: > { %s2166_s8 = sadd.s32 4294967295, %s2090_s14   ;;  %s1832_s15 = sadd.s32 4294967294, %s2090_s14   ;;  %s2090_s14 = sphi %s2151_s14, %s2719_s14   ;;  %s2086_s13 = sphi %s2149_s13, %s2718_s13   ;;  %s2082_s12 = sphi %s2147_s12, %s2717_s12   ;;  %s2078_s11 = sphi %s2145_s11, %s2716_s11  }
   0x6   : > { %s2170_s16 = sadd.s32 1, %s2090_s14   ;;  %s224_s17 = sadd.s32 1, %s2086_s13 }
   0x7   : > { %s221_s18 = ssub.s32 %s2090_s14, %s2170_s16  ;;  %p234_p0 = scmp.ne.s32.totalorder %s2086_s13, %s2082_s12 }
   0x8   : > { %p222_p1 = scmp.eq.s32.totalorder %s221_s18, 0  ;;  %p235_p2 = scmp.eq.s32.totalorder %s2166_s8, 1 }
   0x9   : > { %p240_p3 = scmp.ne.s32.totalorder %s2082_s12, %s2078_s11  ;;  %p241_p4 = scmp.eq.s32.totalorder %s1832_s15, 1 }
   0xa   : > { %s2181_s19 = scalar_select %p222_p1, %s2086_s13, %s224_s17  }
   0xb   : > { %p2183_p5 = por %p235_p2, %p234_p0  ;;  %p2187_p6 = por %p241_p4, %p240_p3 }
   0xc   : > { %p1835_p7 = scmp.ge.s32.totalorder %s2090_s14, 1  ;;  %p292_p8 = scmp.lt.s32.totalorder %s2090_s14, 3 }
   0xe   : > { %p293_p9 = pnand %p1835_p7, %p292_p8 }
   0xf   : > { %s1837_s24 = sshll.u32 (!%p293_p9), %s2166_s8, 6  ;;  %s325_s28 = sand.u32 (!%p293_p9), 1, %s2082_s12  }
  0x10   : > { %296 = sbr.rel (%p293_p9) target bundleno = 1171 (0x493), region = 56  ;;  %p329_p10 = scmp.lt.s32.totalorder (!%p293_p9), %s1837_s24, 127 }
  0x11   : > { %s1836_s29 = sshll.u32 (!%p293_p9), %s325_s28, 2  ;;  %s1944_s10 = sshll.u32 (!%p293_p9), %s2166_s8, 2 }
  0x12   : > { %s1768_s17 = scalar_lea.hbm (!%p293_p9), %s2713_s9, %s1944_s10  ;;  %s327_s18 = scalar_lea.vmem (!%p293_p9), [#allocation3], %s1836_s29 }
  0x13   : > { %s1770_s22 = sshll.u32 (!%p293_p9), %s327_s18, 4  ;;  %s1772_s23 = sshll.u32 (!%p293_p9), %s1768_s17, 4  ;;  %s1771_s22 = int_to_ptr.vmem [resolvable:$true] %s1770_s22  ;;  %s1773_s23 = int_to_ptr.hbm [resolvable:$true] %s1772_s23 }
  0x14   : > { %s1758_s8 = scalar_lea.sflag (!%p293_p9), [#allocation4], %s325_s28  ;;  %s2048_s29 = scalar_lea.hbm (!%p293_p9), %s2713_s9, 8 }
  0x15   : > { %v1948_v0 = vld [vmem:[%s2705_s1 + $0x8] sm:$0xff]  ;;  %v1947_v1 = vld [vmem:[%s2705_s1] sm:$0xff]  ;;  %s2721_s24 = smov (!%p329_p10, %s1837_s24), 127  ;;  %vm451_vm0 = vcmask 261120   ;;  %v1956_v17 = vld [vmem:[%s2707_s3 + $0x38] sm:$0xff]  ;;  %vm1745_vm1 = vcmask 1040384  }
  0x16   : > { %554 = vmatpush.bf16.msra.mxu0 %v1948_v0  ;;  %1965 = vmatpush.bf16.msra.mxu3 %v1948_v0  ;;  %s1838_s27 = sshll.u32 %s2721_s24, 3  ;;  %v1955_v21 = vld [vmem:[%s2707_s3 + $0x30] sm:$0xff]  ;;  %v1954_v22 = vld [vmem:[%s2707_s3 + $0x28] sm:$0xff]  ;;  %v1953_v23 = vld [vmem:[%s2707_s3 + $0x20] sm:$0xff]  ;;  %vm1747_vm2 = vcmask 1042434   ;;  %vm1749_vm3 = vcmask 1041408  }
  0x17   : > { %s2203_s30 = scalar_lea.vmem %s2704_s0, %s1838_s27  ;;  %945 = vmatpush.bf16.msra.mxu1 %v1956_v17  ;;  %v1952_v27 = vld [vmem:[%s2707_s3 + $0x18] sm:$0xff]  ;;  %v1951_v28 = vld [vmem:[%s2707_s3 + $0x10] sm:$0xff]  ;;  %v1950_v29 = vld [vmem:[%s2707_s3 + $0x8] sm:$0xff]  ;;  %s1724_s27 = sld [smem:[#allocation2]] }
  0x18   : > { %v335_v2 = vld [vmem:[%s2203_s30] sm:$0xff]  ;;  %v336_v3 = vld [vmem:[%s2203_s30 + $0x8] sm:$0xff]  ;;  %v337_v5 = vld [vmem:[%s2203_s30 + $0x10] sm:$0xff]  ;;  %s2042_s24 = sshra.s32 %s1773_s23, 4  ;;  %s2043_s24 = int_to_ptr.hbm [resolvable:$true] %s2042_s24 }
  0x19   : > { %v399_v4 = vpack.c.bf16 %v336_v3, %v335_v2  ;;  %v338_v6 = vld [vmem:[%s2203_s30 + $0x18] sm:$0xff]  ;;  %v339_v8 = vld [vmem:[%s2203_s30 + $0x20] sm:$0xff]  ;;  %v340_v9 = vld [vmem:[%s2203_s30 + $0x28] sm:$0xff]  ;;  %s2044_s25 = scalar_lea.hbm %s2043_s24, 4  ;;  %p2049_p0 = scmp.lt.s32.totalorder %s2043_s24, %s2713_s9 }
  0x1a   : > { %555 = vmatpush.bf16.msra.mxu0 %v1947_v1  ;;  %1966 = vmatpush.bf16.msra.mxu3 %v1947_v1  ;;  %v400_v7 = vpack.c.bf16 %v338_v6, %v337_v5  ;;  %v401_v10 = vpack.c.bf16 %v340_v9, %v339_v8  ;;  %v341_v11 = vld [vmem:[%s2203_s30 + $0x30] sm:$0xff]  ;;  %v342_v12 = vld [vmem:[%s2203_s30 + $0x38] sm:$0xff]  ;;  %v343_v14 = vld [vmem:[%s2203_s30 + $0x40] sm:$0xff]  ;;  %p2045_p11 = scmp.ne.s32.totalorder %s2043_s24, %s2044_s25  ;;  %p2050_p1 = scmp.lt.s32.totalorder %s2048_s29, %s2044_s25 }
  0x1b   : > { %v402_v13 = vpack.c.bf16 %v342_v12, %v341_v11  ;;  %v344_v15 = vld [vmem:[%s2203_s30 + $0x48] sm:$0xff]  ;;  %v345_v18 = vld [vmem:[%s2203_s30 + $0x50] sm:$0xff]  ;;  %v346_v19 = vld [vmem:[%s2203_s30 + $0x58] sm:$0xff]  ;;  %946 = vmatpush.bf16.msra.mxu1 %v1955_v21 }
  0x1c   : > { %v403_v16 = vpack.c.bf16 %v344_v15, %v343_v14  ;;  %v404_v20 = vpack.c.bf16 %v346_v19, %v345_v18  ;;  %v347_v24 = vld [vmem:[%s2203_s30 + $0x60] sm:$0xff]  ;;  %v348_v25 = vld [vmem:[%s2203_s30 + $0x68] sm:$0xff]  ;;  %v349_v31 = vld [vmem:[%s2203_s30 + $0x70] sm:$0xff]  ;;  %p2046_p12 = pnand %p2045_p11, %p2183_p5  ;;  %p2051_p2 = por %p2050_p1, %p2049_p0 }
  0x1d   : > { %1847 = vmatmul.msk.bf16.vlgmr.msra.gmra.mxu0 %vm451_vm0, %v399_v4  ;;  %v405_v26 = vpack.c.bf16 %v348_v25, %v347_v24  ;;  %v1949_v30 = vld [vmem:[%s2707_s3] sm:$0xff]  ;;  %v350_v32 = vld [vmem:[%s2203_s30 + $0x78] sm:$0xff]  ;;  %v352_v35 = vld [vmem:[%s2203_s30 + $0x88] sm:$0xff] }
  0x1e   : > { %1967 = vmatpush.bf16.msrb.mxu3 %v1956_v17  ;;  %v406_v33 = vpack.c.bf16 %v350_v32, %v349_v31  ;;  %v351_v34 = vld [vmem:[%s2203_s30 + $0x80] sm:$0xff]  ;;  %v353_v44 = vld [vmem:[%s2203_s30 + $0x90] sm:$0xff]  ;;  %v354_v45 = vld [vmem:[%s2203_s30 + $0x98] sm:$0xff]  ;;  %p2047_p13 = pneg %p2046_p12 }
  0x1f   : > { %947 = vmatpush.bf16.msra.mxu1 %v1954_v22  ;;  %v407_v36 = vpack.c.bf16 %v352_v35, %v351_v34  ;;  %v2258_v38 = vld [vmem:[%s2706_s2] ss:$0 sm:$0xff]  ;;  %v408_v49 = vpack.c.bf16 %v354_v45, %v353_v44  ;;  %v356_v57 = vld [vmem:[%s2203_s30 + $0xa8] sm:$0xff]  ;;  %v357_v4 = vld [vmem:[%s2203_s30 + $0xb0] sm:$0xff] }
  0x20   : > { %v355_v56 = vld [vmem:[%s2203_s30 + $0xa0] sm:$0xff]  ;;  %v358_v5 = vld [vmem:[%s2203_s30 + $0xb8] sm:$0xff]  ;;  %v360_v17 = vld [vmem:[%s2203_s30 + $0xc8] sm:$0xff]  ;;  %p2052_p3 = pnand %p2051_p2, %p2047_p13 }
  0x21   : > { %v409_v61 = vpack.c.bf16 %v356_v57, %v355_v56  ;;  %v410_v9 = vpack.c.bf16 %v358_v5, %v357_v4  ;;  %v2293_v45 = vld [vmem:[%s2709_s5 + $0x38] sm:$0xff]  ;;  %v365_v57 = vld [vmem:[%s2203_s30 + $0xf0] sm:$0xff] }
  0x22   : > { %1968 = vmatpush.bf16.msrb.mxu3 %v1955_v21  ;;  %1342 = vmatpush.bf16.msra.mxu2 %v2293_v45 }
  0x23   : > { %948 = vmatpush.bf16.msra.mxu1 %v1953_v23 }
  0x26   : > { %1969 = vmatpush.bf16.msrb.mxu3 %v1954_v22 }
  0x27   : > { %949 = vmatpush.bf16.msra.mxu1 %v1952_v27 }
  0x2a   : > { %1970 = vmatpush.bf16.msrb.mxu3 %v1953_v23 }
  0x2b   : > { %950 = vmatpush.bf16.msra.mxu1 %v1951_v28 }
  0x2d   : > { %1848 = vmatmul.msk.bf16.gmra.mxu0 %vm451_vm0, %v400_v7 }
  0x2e   : > { %1971 = vmatpush.bf16.msrb.mxu3 %v1952_v27 }
  0x2f   : > { %951 = vmatpush.bf16.msra.mxu1 %v1950_v29 }
  0x32   : > { %1972 = vmatpush.bf16.msrb.mxu3 %v1951_v28  ;;  %v361_v28 = vld [vmem:[%s2203_s30 + $0xd0] sm:$0xff] }
  0x33   : > { %952 = vmatpush.bf16.msra.mxu1 %v1949_v30 }
  0x36   : > { %1973 = vmatpush.bf16.msrb.mxu3 %v1950_v29  ;;  %v362_v29 = vld [vmem:[%s2203_s30 + $0xd8] sm:$0xff] }
  0x3a   : > { %1974 = vmatpush.bf16.msrb.mxu3 %v1949_v30 }
  0x3d   : > { %1849 = vmatmul.msk.bf16.gmra.mxu0 %vm451_vm0, %v401_v10 }
  0x4d   : > { %1850 = vmatmul.msk.bf16.gmra.mxu0 %vm451_vm0, %v402_v13 }
  0x5d   : > { %1851 = vmatmul.msk.bf16.gmra.mxu0 %vm451_vm0, %v403_v16  ;;  %v359_v16 = vld [vmem:[%s2203_s30 + $0xc0] sm:$0xff] }
  0x5e   : > { %v411_v21 = vpack.c.bf16 %v360_v17, %v359_v16 }
  0x6d   : > { %1852 = vmatmul.msk.bf16.gmra.mxu0 %vm451_vm0, %v404_v20 }
  0x7d   : > { %1853 = vmatmul.msk.bf16.gmra.mxu0 %vm451_vm0, %v405_v26 }
  0x8d   : > { %1854 = vmatmul.msk.bf16.gmra.mxu0 %vm451_vm0, %v406_v33  ;;  %v412_v33 = vpack.c.bf16 %v362_v29, %v361_v28 }
  0x9a   : > { %v557_v37 = vpop.f32.mrf.mxu0 }
  0x9b   : > { %v558_v39 = vadd.f32 %v2258_v38, %v557_v37 }
  0x9d   : > { %1855 = vmatmul.msk.bf16.gmra.mxu0 %vm451_vm0, %v407_v36  ;;  %v717_v41 = vmul.f32 0.01, %v558_v39 }
  0x9f   : > { %v781_v46 = vmax.f32 %v558_v39, %v717_v41  ;;  %v363_v41 = vld [vmem:[%s2203_s30 + $0xe0] sm:$0xff] }
  0xa2   : > { %v559_v40 = vpop.f32.mrf.mxu0 }
  0xa3   : > { %v560_v42 = vadd.f32 %v2258_v38, %v559_v40 }
  0xa5   : > { %v718_v43 = vmul.f32 0.01, %v560_v42 }
  0xa7   : > { %v782_v47 = vmax.f32 %v560_v42, %v718_v43  ;;  %v364_v42 = vld [vmem:[%s2203_s30 + $0xe8] sm:$0xff] }
  0xa9   : > { %v845_v48 = vpack.c.bf16 %v782_v47, %v781_v46  ;;  %v413_v47 = vpack.c.bf16 %v364_v42, %v363_v41 }
  0xaa   : > { %v562_v50 = vpop.f32.mrf.mxu0 }
  0xab   : > { %953 = vmatmul.bf16.vlgmr.msra.gmra.mxu1 %v845_v48  ;;  %v563_v51 = vadd.f32 %v2258_v38, %v562_v50 }
  0xad   : > { %1856 = vmatmul.msk.bf16.gmra.mxu0 %vm451_vm0, %v408_v49  ;;  %v719_v53 = vmul.f32 0.01, %v563_v51  ;;  %v2299_v49 = vld [vmem:[%s2709_s5 + $0x30] sm:$0xff] }
  0xae   : > { %1343 = vmatpush.bf16.msra.mxu2 %v2299_v49 }
  0xaf   : > { %v783_v58 = vmax.f32 %v563_v51, %v719_v53  ;;  %v2307_v51 = vld [vmem:[%s2709_s5 + $0x28] sm:$0xff] }
  0xb2   : > { %v564_v52 = vpop.f32.mrf.mxu0  ;;  %1344 = vmatpush.bf16.msra.mxu2 %v2307_v51 }
  0xb3   : > { %v565_v54 = vadd.f32 %v2258_v38, %v564_v52 }
  0xb5   : > { %v720_v55 = vmul.f32 0.01, %v565_v54 }
  0xb7   : > { %v784_v59 = vmax.f32 %v565_v54, %v720_v55  ;;  %v2314_v55 = vld [vmem:[%s2709_s5 + $0x20] sm:$0xff] }
  0xb8   : > { %1345 = vmatpush.bf16.msra.mxu2 %v2314_v55 }
  0xb9   : > { %v846_v60 = vpack.c.bf16 %v784_v59, %v783_v58  ;;  %v366_v58 = vld [vmem:[%s2203_s30 + $0xf8] sm:$0xff] }
  0xba   : > { %v567_v62 = vpop.f32.mrf.mxu0 }
  0xbb   : > { %958 = vmatmul.bf16.gmra.mxu1 %v846_v60  ;;  %v568_v63 = vadd.f32 %v2258_v38, %v567_v62 }
  0xbd   : > { %1857 = vmatmul.msk.bf16.gmra.mxu0 %vm451_vm0, %v409_v61  ;;  %v721_v1 = vmul.f32 0.01, %v568_v63  ;;  %v2322_v61 = vld [vmem:[%s2709_s5 + $0x18] sm:$0xff] }
  0xbe   : > { %1346 = vmatpush.bf16.msra.mxu2 %v2322_v61 }
  0xbf   : > { %v785_v6 = vmax.f32 %v568_v63, %v721_v1  ;;  %v414_v63 = vpack.c.bf16 %v366_v58, %v365_v57  ;;  %v2328_v1 = vld [vmem:[%s2709_s5 + $0x10] sm:$0xff] }
  0xc2   : > { %v569_v0 = vpop.f32.mrf.mxu0  ;;  %1347 = vmatpush.bf16.msra.mxu2 %v2328_v1 }
  0xc3   : > { %v570_v2 = vadd.f32 %v2258_v38, %v569_v0 }
  0xc5   : > { %v722_v3 = vmul.f32 0.01, %v570_v2 }
  0xc7   : > { %v786_v7 = vmax.f32 %v570_v2, %v722_v3  ;;  %v2336_v3 = vld [vmem:[%s2709_s5 + $0x8] sm:$0xff] }
  0xc8   : > { %1348 = vmatpush.bf16.msra.mxu2 %v2336_v3 }
  0xc9   : > { %v847_v8 = vpack.c.bf16 %v786_v7, %v785_v6  ;;  %v2343_v7 = vld [vmem:[%s2709_s5] sm:$0xff] }
  0xca   : > { %v572_v10 = vpop.f32.mrf.mxu0 }
  0xcb   : > { %963 = vmatmul.bf16.gmra.mxu1 %v847_v8  ;;  %v573_v11 = vadd.f32 %v2258_v38, %v572_v10  ;;  %v368_v10 = vld [vmem:[%s2203_s30 + $0x108] sm:$0xff] }
  0xcc   : > { %1349 = vmatpush.bf16.msra.mxu2 %v2343_v7 }
  0xcd   : > { %1858 = vmatmul.msk.bf16.gmra.mxu0 %vm451_vm0, %v410_v9  ;;  %v723_v13 = vmul.f32 0.01, %v573_v11  ;;  %v367_v9 = vld [vmem:[%s2203_s30 + $0x100] sm:$0xff] }
  0xcf   : > { %v787_v18 = vmax.f32 %v573_v11, %v723_v13 }
  0xd2   : > { %v574_v12 = vpop.f32.mrf.mxu0 }
  0xd3   : > { %v575_v14 = vadd.f32 %v2258_v38, %v574_v12 }
  0xd5   : > { %v724_v15 = vmul.f32 0.01, %v575_v14 }
  0xd7   : > { %v788_v19 = vmax.f32 %v575_v14, %v724_v15  ;;  %v415_v14 = vpack.c.bf16 %v368_v10, %v367_v9  ;;  %v374_v9 = vld [vmem:[%s2203_s30 + $0x138] sm:$0xff] }
  0xd9   : > { %v848_v20 = vpack.c.bf16 %v788_v19, %v787_v18 }
  0xda   : > { %v577_v22 = vpop.f32.mrf.mxu0 }
  0xdb   : > { %968 = vmatmul.bf16.gmra.mxu1 %v848_v20  ;;  %v578_v23 = vadd.f32 %v2258_v38, %v577_v22  ;;  %v370_v22 = vld [vmem:[%s2203_s30 + $0x118] sm:$0xff] }
  0xdd   : > { %1859 = vmatmul.msk.bf16.gmra.mxu0 %vm451_vm0, %v411_v21  ;;  %v725_v25 = vmul.f32 0.01, %v578_v23  ;;  %v369_v21 = vld [vmem:[%s2203_s30 + $0x110] sm:$0xff] }
  0xde   : > { %v416_v28 = vpack.c.bf16 %v370_v22, %v369_v21 }
  0xdf   : > { %v789_v30 = vmax.f32 %v578_v23, %v725_v25 }
  0xe2   : > { %v579_v24 = vpop.f32.mrf.mxu0 }
  0xe3   : > { %v580_v26 = vadd.f32 %v2258_v38, %v579_v24 }
  0xe5   : > { %v726_v27 = vmul.f32 0.01, %v580_v26 }
  0xe7   : > { %v790_v31 = vmax.f32 %v580_v26, %v726_v27  ;;  %v2356_v26 = vld [vmem:[%s2708_s4] ss:$0 sm:$0xff] }
  0xe9   : > { %v849_v32 = vpack.c.bf16 %v790_v31, %v789_v30 }
  0xea   : > { %v582_v34 = vpop.f32.mrf.mxu0 }
  0xeb   : > { %973 = vmatmul.bf16.gmra.mxu1 %v849_v32  ;;  %v583_v35 = vadd.f32 %v2258_v38, %v582_v34 }
  0xed   : > { %1860 = vmatmul.msk.bf16.gmra.mxu0 %vm451_vm0, %v412_v33  ;;  %v727_v37 = vmul.f32 0.01, %v583_v35 }
  0xef   : > { %v791_v43 = vmax.f32 %v583_v35, %v727_v37 }
  0xf2   : > { %v584_v36 = vpop.f32.mrf.mxu0 }
  0xf3   : > { %v585_v39 = vadd.f32 %v2258_v38, %v584_v36 }
  0xf5   : > { %v728_v40 = vmul.f32 0.01, %v585_v39 }
  0xf7   : > { %v792_v44 = vmax.f32 %v585_v39, %v728_v40 }
  0xf9   : > { %v850_v46 = vpack.c.bf16 %v792_v44, %v791_v43  ;;  %v371_v43 = vld [vmem:[%s2203_s30 + $0x120] sm:$0xff]  ;;  %v372_v44 = vld [vmem:[%s2203_s30 + $0x128] sm:$0xff] }
  0xfa   : > { %v587_v48 = vpop.f32.mrf.mxu0 }
  0xfb   : > { %978 = vmatmul.bf16.gmra.mxu1 %v850_v46  ;;  %v588_v50 = vadd.f32 %v2258_v38, %v587_v48 }
  0xfd   : > { %1861 = vmatmul.msk.bf16.gmra.mxu0 %vm451_vm0, %v413_v47  ;;  %v729_v53 = vmul.f32 0.01, %v588_v50 }
  0xff   : > { %v793_v59 = vmax.f32 %v588_v50, %v729_v53  ;;  %v417_v53 = vpack.c.bf16 %v372_v44, %v371_v43 }
 0x102   : > { %v589_v52 = vpop.f32.mrf.mxu0 }
 0x103   : > { %v590_v54 = vadd.f32 %v2258_v38, %v589_v52 }
 0x105   : > { %v730_v56 = vmul.f32 0.01, %v590_v54 }
 0x107   : > { %v794_v60 = vmax.f32 %v590_v54, %v730_v56 }
 0x109   : > { %v851_v62 = vpack.c.bf16 %v794_v60, %v793_v59 }
 0x10a   : > { %v592_v0 = vpop.f32.mrf.mxu0 }
 0x10b   : > { %983 = vmatmul.bf16.gmra.mxu1 %v851_v62  ;;  %v593_v2 = vadd.f32 %v2258_v38, %v592_v0 }
 0x10d   : > { %1862 = vmatmul.msk.bf16.gmra.mxu0 %vm451_vm0, %v414_v63  ;;  %v731_v5 = vmul.f32 0.01, %v593_v2 }
 0x10f   : > { %v795_v11 = vmax.f32 %v593_v2, %v731_v5 }
 0x112   : > { %v594_v4 = vpop.f32.mrf.mxu0 }
 0x113   : > { %v595_v6 = vadd.f32 %v2258_v38, %v594_v4 }
 0x115   : > { %v732_v8 = vmul.f32 0.01, %v595_v6 }
 0x117   : > { %v796_v12 = vmax.f32 %v595_v6, %v732_v8  ;;  %v373_v8 = vld [vmem:[%s2203_s30 + $0x130] sm:$0xff] }
 0x119   : > { %v852_v13 = vpack.c.bf16 %v796_v12, %v795_v11 }
 0x11a   : > { %v597_v15 = vpop.f32.mrf.mxu0 }
 0x11b   : > { %988 = vmatmul.bf16.gmra.mxu1 %v852_v13  ;;  %v598_v16 = vadd.f32 %v2258_v38, %v597_v15  ;;  %v418_v15 = vpack.c.bf16 %v374_v9, %v373_v8 }
 0x11d   : > { %1863 = vmatmul.msk.bf16.gmra.mxu0 %vm451_vm0, %v415_v14  ;;  %v733_v18 = vmul.f32 0.01, %v598_v16 }
 0x11f   : > { %v797_v23 = vmax.f32 %v598_v16, %v733_v18 }
 0x122   : > { %v599_v17 = vpop.f32.mrf.mxu0 }
 0x123   : > { %v600_v19 = vadd.f32 %v2258_v38, %v599_v17 }
 0x125   : > { %v734_v20 = vmul.f32 0.01, %v600_v19 }
 0x127   : > { %v798_v24 = vmax.f32 %v600_v19, %v734_v20 }
 0x128   : > { %v954_v25 = vpop.f32.mrf.mxu1 }
 0x129   : > { %v853_v27 = vpack.c.bf16 %v798_v24, %v797_v23  ;;  %v955_v30 = vadd.f32 %v2356_v26, %v954_v25 }
 0x12a   : > { %v602_v29 = vpop.f32.mrf.mxu0 }
 0x12b   : > { %993 = vmatmul.bf16.gmra.mxu1 %v853_v27  ;;  %v603_v31 = vadd.f32 %v2258_v38, %v602_v29  ;;  %v1114_v33 = vmul.f32 0.01, %v955_v30 }
 0x12d   : > { %1864 = vmatmul.msk.bf16.gmra.mxu0 %vm451_vm0, %v416_v28  ;;  %v735_v36 = vmul.f32 0.01, %v603_v31  ;;  %v1178_v40 = vmax.f32 %v955_v30, %v1114_v33  ;;  %v375_v30 = vld [vmem:[%s2203_s30 + $0x140] sm:$0xff] }
 0x12f   : > { %v799_v46 = vmax.f32 %v603_v31, %v735_v36  ;;  %v376_v31 = vld [vmem:[%s2203_s30 + $0x148] sm:$0xff] }
 0x130   : > { %v956_v32 = vpop.f32.mrf.mxu1 }
 0x131   : > { %v957_v34 = vadd.f32 %v2356_v26, %v956_v32 }
 0x132   : > { %v604_v35 = vpop.f32.mrf.mxu0 }
 0x133   : > { %v1115_v37 = vmul.f32 0.01, %v957_v34  ;;  %v605_v39 = vadd.f32 %v2258_v38, %v604_v35 }
 0x135   : > { %v736_v41 = vmul.f32 0.01, %v605_v39  ;;  %v1179_v42 = vmax.f32 %v957_v34, %v1115_v37  ;;  %v419_v37 = vpack.c.bf16 %v376_v31, %v375_v30 }
 0x137   : > { %v1242_v47 = vpack.c.bf16 %v1179_v42, %v1178_v40  ;;  %v800_v48 = vmax.f32 %v605_v39, %v736_v41 }
 0x138   : > { %v959_v50 = vpop.f32.mrf.mxu1 }
 0x139   : > { %1350 = vmatmul.bf16.vlgmr.msra.gmra.mxu2 %v1242_v47  ;;  %v854_v52 = vpack.c.bf16 %v800_v48, %v799_v46  ;;  %v960_v56 = vadd.f32 %v2356_v26, %v959_v50 }
 0x13a   : > { %v607_v54 = vpop.f32.mrf.mxu0 }
 0x13b   : > { %998 = vmatmul.bf16.gmra.mxu1 %v854_v52  ;;  %v608_v57 = vadd.f32 %v2258_v38, %v607_v54  ;;  %v1116_v59 = vmul.f32 0.01, %v960_v56 }
 0x13d   : > { %1865 = vmatmul.msk.bf16.gmra.mxu0 %vm451_vm0, %v417_v53  ;;  %v737_v63 = vmul.f32 0.01, %v608_v57  ;;  %v1180_v4 = vmax.f32 %v960_v56, %v1116_v59  ;;  %v377_v56 = vld [vmem:[%s2203_s30 + $0x150] sm:$0xff] }
 0x13f   : > { %v801_v10 = vmax.f32 %v608_v57, %v737_v63  ;;  %v378_v57 = vld [vmem:[%s2203_s30 + $0x158] sm:$0xff] }
 0x140   : > { %v961_v58 = vpop.f32.mrf.mxu1 }
 0x141   : > { %v962_v60 = vadd.f32 %v2356_v26, %v961_v58 }
 0x142   : > { %v609_v62 = vpop.f32.mrf.mxu0 }
 0x143   : > { %v1117_v0 = vmul.f32 0.01, %v962_v60  ;;  %v610_v2 = vadd.f32 %v2258_v38, %v609_v62 }
 0x145   : > { %v738_v5 = vmul.f32 0.01, %v610_v2  ;;  %v1181_v6 = vmax.f32 %v962_v60, %v1117_v0  ;;  %v420_v0 = vpack.c.bf16 %v378_v57, %v377_v56 }
 0x147   : > { %v1243_v11 = vpack.c.bf16 %v1181_v6, %v1180_v4  ;;  %v802_v12 = vmax.f32 %v610_v2, %v738_v5 }
 0x148   : > { %v964_v13 = vpop.f32.mrf.mxu1 }
 0x149   : > { %1355 = vmatmul.bf16.gmra.mxu2 %v1243_v11  ;;  %v855_v14 = vpack.c.bf16 %v802_v12, %v801_v10  ;;  %v965_v17 = vadd.f32 %v2356_v26, %v964_v13 }
 0x14a   : > { %v612_v16 = vpop.f32.mrf.mxu0 }
 0x14b   : > { %1003 = vmatmul.bf16.gmra.mxu1 %v855_v14  ;;  %v613_v18 = vadd.f32 %v2258_v38, %v612_v16  ;;  %v1118_v20 = vmul.f32 0.01, %v965_v17 }
 0x14d   : > { %1866 = vmatmul.msk.bf16.gmra.mxu0 %vm451_vm0, %v418_v15  ;;  %v739_v23 = vmul.f32 0.01, %v613_v18  ;;  %v1182_v27 = vmax.f32 %v965_v17, %v1118_v20  ;;  %v379_v17 = vld [vmem:[%s2203_s30 + $0x160] sm:$0xff] }
 0x14f   : > { %v803_v32 = vmax.f32 %v613_v18, %v739_v23  ;;  %v380_v18 = vld [vmem:[%s2203_s30 + $0x168] sm:$0xff] }
 0x150   : > { %v966_v19 = vpop.f32.mrf.mxu1 }
 0x151   : > { %v967_v21 = vadd.f32 %v2356_v26, %v966_v19 }
 0x152   : > { %v614_v22 = vpop.f32.mrf.mxu0 }
 0x153   : > { %v1119_v24 = vmul.f32 0.01, %v967_v21  ;;  %v615_v25 = vadd.f32 %v2258_v38, %v614_v22 }
 0x155   : > { %v740_v28 = vmul.f32 0.01, %v615_v25  ;;  %v1183_v29 = vmax.f32 %v967_v21, %v1119_v24  ;;  %v421_v24 = vpack.c.bf16 %v380_v18, %v379_v17 }
 0x157   : > { %v1244_v33 = vpack.c.bf16 %v1183_v29, %v1182_v27  ;;  %v804_v34 = vmax.f32 %v615_v25, %v740_v28 }
 0x158   : > { %v969_v35 = vpop.f32.mrf.mxu1 }
 0x159   : > { %1360 = vmatmul.bf16.gmra.mxu2 %v1244_v33  ;;  %v856_v36 = vpack.c.bf16 %v804_v34, %v803_v32  ;;  %v970_v40 = vadd.f32 %v2356_v26, %v969_v35 }
 0x15a   : > { %v617_v39 = vpop.f32.mrf.mxu0 }
 0x15b   : > { %1008 = vmatmul.bf16.gmra.mxu1 %v856_v36  ;;  %v618_v41 = vadd.f32 %v2258_v38, %v617_v39  ;;  %v1120_v43 = vmul.f32 0.01, %v970_v40 }
 0x15d   : > { %1867 = vmatmul.msk.bf16.gmra.mxu0 %vm451_vm0, %v419_v37  ;;  %v741_v47 = vmul.f32 0.01, %v618_v41  ;;  %v1184_v52 = vmax.f32 %v970_v40, %v1120_v43  ;;  %v381_v40 = vld [vmem:[%s2203_s30 + $0x170] sm:$0xff] }
 0x15f   : > { %v805_v58 = vmax.f32 %v618_v41, %v741_v47  ;;  %v382_v41 = vld [vmem:[%s2203_s30 + $0x178] sm:$0xff] }
 0x160   : > { %v971_v42 = vpop.f32.mrf.mxu1 }
 0x161   : > { %v972_v44 = vadd.f32 %v2356_v26, %v971_v42 }
 0x162   : > { %v619_v46 = vpop.f32.mrf.mxu0 }
 0x163   : > { %v1121_v48 = vmul.f32 0.01, %v972_v44  ;;  %v620_v50 = vadd.f32 %v2258_v38, %v619_v46 }
 0x165   : > { %v742_v53 = vmul.f32 0.01, %v620_v50  ;;  %v1185_v54 = vmax.f32 %v972_v44, %v1121_v48  ;;  %v422_v48 = vpack.c.bf16 %v382_v41, %v381_v40 }
 0x167   : > { %v806_v59 = vmax.f32 %v620_v50, %v742_v53  ;;  %v1245_v60 = vpack.c.bf16 %v1185_v54, %v1184_v52 }
 0x168   : > { %v974_v62 = vpop.f32.mrf.mxu1 }
 0x169   : > { %1365 = vmatmul.bf16.gmra.mxu2 %v1245_v60  ;;  %v857_v63 = vpack.c.bf16 %v806_v59, %v805_v58  ;;  %v975_v4 = vadd.f32 %v2356_v26, %v974_v62 }
 0x16a   : > { %v622_v2 = vpop.f32.mrf.mxu0 }
 0x16b   : > { %1013 = vmatmul.bf16.gmra.mxu1 %v857_v63  ;;  %v623_v5 = vadd.f32 %v2258_v38, %v622_v2  ;;  %v1122_v8 = vmul.f32 0.01, %v975_v4 }
 0x16d   : > { %1868 = vmatmul.msk.bf16.gmra.mxu0 %vm451_vm0, %v420_v0  ;;  %v743_v11 = vmul.f32 0.01, %v623_v5  ;;  %v1186_v14 = vmax.f32 %v975_v4, %v1122_v8  ;;  %v383_v4 = vld [vmem:[%s2203_s30 + $0x180] sm:$0xff] }
 0x16f   : > { %v807_v19 = vmax.f32 %v623_v5, %v743_v11  ;;  %v384_v5 = vld [vmem:[%s2203_s30 + $0x188] sm:$0xff] }
 0x170   : > { %v976_v6 = vpop.f32.mrf.mxu1 }
 0x171   : > { %v977_v9 = vadd.f32 %v2356_v26, %v976_v6 }
 0x172   : > { %v624_v10 = vpop.f32.mrf.mxu0 }
 0x173   : > { %v1123_v12 = vmul.f32 0.01, %v977_v9  ;;  %v625_v13 = vadd.f32 %v2258_v38, %v624_v10 }
 0x175   : > { %v744_v15 = vmul.f32 0.01, %v625_v13  ;;  %v1187_v16 = vmax.f32 %v977_v9, %v1123_v12  ;;  %v423_v12 = vpack.c.bf16 %v384_v5, %v383_v4  ;;  %v394_v4 = vld [vmem:[%s2203_s30 + $0x1d8] sm:$0xff] }
 0x177   : > { %v808_v20 = vmax.f32 %v625_v13, %v744_v15  ;;  %v1246_v21 = vpack.c.bf16 %v1187_v16, %v1186_v14 }
 0x178   : > { %v979_v22 = vpop.f32.mrf.mxu1 }
 0x179   : > { %1370 = vmatmul.bf16.gmra.mxu2 %v1246_v21  ;;  %v858_v23 = vpack.c.bf16 %v808_v20, %v807_v19  ;;  %v980_v27 = vadd.f32 %v2356_v26, %v979_v22 }
 0x17a   : > { %v627_v25 = vpop.f32.mrf.mxu0 }
 0x17b   : > { %1018 = vmatmul.bf16.gmra.mxu1 %v858_v23  ;;  %v628_v28 = vadd.f32 %v2258_v38, %v627_v25  ;;  %v1124_v30 = vmul.f32 0.01, %v980_v27 }
 0x17d   : > { %1869 = vmatmul.msk.bf16.gmra.mxu0 %vm451_vm0, %v421_v24  ;;  %v745_v33 = vmul.f32 0.01, %v628_v28  ;;  %v1188_v36 = vmax.f32 %v980_v27, %v1124_v30  ;;  %v385_v27 = vld [vmem:[%s2203_s30 + $0x190] sm:$0xff] }
 0x17f   : > { %v809_v42 = vmax.f32 %v628_v28, %v745_v33  ;;  %v386_v28 = vld [vmem:[%s2203_s30 + $0x198] sm:$0xff] }
 0x180   : > { %v981_v29 = vpop.f32.mrf.mxu1 }
 0x181   : > { %v982_v31 = vadd.f32 %v2356_v26, %v981_v29 }
 0x182   : > { %v629_v32 = vpop.f32.mrf.mxu0 }
 0x183   : > { %v1125_v34 = vmul.f32 0.01, %v982_v31  ;;  %v630_v35 = vadd.f32 %v2258_v38, %v629_v32 }
 0x185   : > { %v746_v37 = vmul.f32 0.01, %v630_v35  ;;  %v1189_v39 = vmax.f32 %v982_v31, %v1125_v34  ;;  %v424_v34 = vpack.c.bf16 %v386_v28, %v385_v27 }
 0x187   : > { %v810_v43 = vmax.f32 %v630_v35, %v746_v37  ;;  %v1247_v44 = vpack.c.bf16 %v1189_v39, %v1188_v36  ;;  %v391_v36 = vld [vmem:[%s2203_s30 + $0x1c0] sm:$0xff]  ;;  %v392_v37 = vld [vmem:[%s2203_s30 + $0x1c8] sm:$0xff] }
 0x188   : > { %v984_v46 = vpop.f32.mrf.mxu1  ;;  %v427_v39 = vpack.c.bf16 %v392_v37, %v391_v36 }
 0x189   : > { %1375 = vmatmul.bf16.gmra.mxu2 %v1247_v44  ;;  %v859_v47 = vpack.c.bf16 %v810_v43, %v809_v42  ;;  %v985_v52 = vadd.f32 %v2356_v26, %v984_v46 }
 0x18a   : > { %v632_v50 = vpop.f32.mrf.mxu0  ;;  %1875 = vmatmul.msk.bf16.vlgmr.msra.gmra.mxu3 %vm451_vm0, %v427_v39 }
 0x18b   : > { %1023 = vmatmul.bf16.gmra.mxu1 %v859_v47  ;;  %v633_v53 = vadd.f32 %v2258_v38, %v632_v50  ;;  %v1126_v56 = vmul.f32 0.01, %v985_v52  ;;  %1975 = vmatpush.bf16.msra.mxu3 %v2293_v45 }
 0x18d   : > { %1870 = vmatmul.msk.bf16.gmra.mxu0 %vm451_vm0, %v422_v48  ;;  %v747_v59 = vmul.f32 0.01, %v633_v53  ;;  %v1190_v63 = vmax.f32 %v985_v52, %v1126_v56  ;;  %v387_v56 = vld [vmem:[%s2203_s30 + $0x1a0] sm:$0xff] }
 0x18f   : > { %v811_v6 = vmax.f32 %v633_v53, %v747_v59  ;;  %1976 = vmatpush.bf16.msra.mxu3 %v2299_v49 }
 0x190   : > { %v986_v54 = vpop.f32.mrf.mxu1 }
 0x191   : > { %v987_v57 = vadd.f32 %v2356_v26, %v986_v54 }
 0x192   : > { %v634_v58 = vpop.f32.mrf.mxu0 }
 0x193   : > { %v1127_v60 = vmul.f32 0.01, %v987_v57  ;;  %v635_v62 = vadd.f32 %v2258_v38, %v634_v58  ;;  %1977 = vmatpush.bf16.msra.mxu3 %v2307_v51 }
 0x195   : > { %v748_v0 = vmul.f32 0.01, %v635_v62  ;;  %v1191_v2 = vmax.f32 %v987_v57, %v1127_v60  ;;  %v388_v57 = vld [vmem:[%s2203_s30 + $0x1a8] sm:$0xff] }
 0x197   : > { %v812_v8 = vmax.f32 %v635_v62, %v748_v0  ;;  %v1248_v9 = vpack.c.bf16 %v1191_v2, %v1190_v63  ;;  %v425_v63 = vpack.c.bf16 %v388_v57, %v387_v56  ;;  %v393_v2 = vld [vmem:[%s2203_s30 + $0x1d0] sm:$0xff]  ;;  %1978 = vmatpush.bf16.msra.mxu3 %v2314_v55 }
 0x198   : > { %v989_v10 = vpop.f32.mrf.mxu1  ;;  %v428_v49 = vpack.c.bf16 %v394_v4, %v393_v2  ;;  %v397_v4 = vld [vmem:[%s2203_s30 + $0x1f0] sm:$0xff] }
 0x199   : > { %1380 = vmatmul.bf16.gmra.mxu2 %v1248_v9  ;;  %v860_v11 = vpack.c.bf16 %v812_v8, %v811_v6  ;;  %v990_v14 = vadd.f32 %v2356_v26, %v989_v10  ;;  %v2434_v8 = vld [vmem:[%s2710_s6] ss:$0 sm:$0xff] }
 0x19a   : > { %v637_v13 = vpop.f32.mrf.mxu0  ;;  %1876 = vmatmul.msk.bf16.gmra.mxu3 %vm451_vm0, %v428_v49  ;;  %v398_v49 = vld [vmem:[%s2203_s30 + $0x1f8] sm:$0xff] }
 0x19b   : > { %1028 = vmatmul.bf16.gmra.mxu1 %v860_v11  ;;  %v638_v15 = vadd.f32 %v2258_v38, %v637_v13  ;;  %v1128_v17 = vmul.f32 0.01, %v990_v14  ;;  %1979 = vmatpush.bf16.msra.mxu3 %v2322_v61 }
 0x19d   : > { %1871 = vmatmul.msk.bf16.gmra.mxu0 %vm451_vm0, %v423_v12  ;;  %v749_v20 = vmul.f32 0.01, %v638_v15  ;;  %v1192_v23 = vmax.f32 %v990_v14, %v1128_v17 }
 0x19f   : > { %v813_v29 = vmax.f32 %v638_v15, %v749_v20  ;;  %1980 = vmatpush.bf16.msra.mxu3 %v2328_v1 }
 0x1a0   : > { %v991_v16 = vpop.f32.mrf.mxu1 }
 0x1a1   : > { %v992_v18 = vadd.f32 %v2356_v26, %v991_v16 }
 0x1a2   : > { %v639_v19 = vpop.f32.mrf.mxu0 }
 0x1a3   : > { %v1129_v21 = vmul.f32 0.01, %v992_v18  ;;  %v640_v22 = vadd.f32 %v2258_v38, %v639_v19  ;;  %1981 = vmatpush.bf16.msra.mxu3 %v2336_v3 }
 0x1a5   : > { %v750_v24 = vmul.f32 0.01, %v640_v22  ;;  %v1193_v25 = vmax.f32 %v992_v18, %v1129_v21  ;;  %v389_v21 = vld [vmem:[%s2203_s30 + $0x1b0] sm:$0xff] }
 0x1a7   : > { %v814_v30 = vmax.f32 %v640_v22, %v750_v24  ;;  %v1249_v31 = vpack.c.bf16 %v1193_v25, %v1192_v23  ;;  %v390_v22 = vld [vmem:[%s2203_s30 + $0x1b8] sm:$0xff]  ;;  %1982 = vmatpush.bf16.msra.mxu3 %v2343_v7 }
 0x1a8   : > { %v994_v32 = vpop.f32.mrf.mxu1 }
 0x1a9   : > { %1385 = vmatmul.bf16.gmra.mxu2 %v1249_v31  ;;  %v861_v33 = vpack.c.bf16 %v814_v30, %v813_v29  ;;  %v995_v40 = vadd.f32 %v2356_v26, %v994_v32  ;;  %v426_v31 = vpack.c.bf16 %v390_v22, %v389_v21 }
 0x1aa   : > { %v642_v35 = vpop.f32.mrf.mxu0 }
 0x1ab   : > { %1033 = vmatmul.bf16.gmra.mxu1 %v861_v33  ;;  %v643_v41 = vadd.f32 %v2258_v38, %v642_v35  ;;  %v1130_v43 = vmul.f32 0.01, %v995_v40  ;;  %v395_v33 = vld [vmem:[%s2203_s30 + $0x1e0] sm:$0xff] }
 0x1ad   : > { %1872 = vmatmul.msk.bf16.gmra.mxu0 %vm451_vm0, %v424_v34  ;;  %v751_v47 = vmul.f32 0.01, %v643_v41  ;;  %v1194_v52 = vmax.f32 %v995_v40, %v1130_v43  ;;  %v396_v34 = vld [vmem:[%s2203_s30 + $0x1e8] sm:$0xff] }
 0x1ae   : > { %v429_v35 = vpack.c.bf16 %v396_v34, %v395_v33 }
 0x1af   : > { %v815_v58 = vmax.f32 %v643_v41, %v751_v47 }
 0x1b0   : > { %v996_v42 = vpop.f32.mrf.mxu1  ;;  %1877 = vmatmul.msk.bf16.gmra.mxu3 %vm451_vm0, %v429_v35 }
 0x1b1   : > { %v997_v44 = vadd.f32 %v2356_v26, %v996_v42 }
 0x1b2   : > { %v644_v46 = vpop.f32.mrf.mxu0 }
 0x1b3   : > { %v1131_v48 = vmul.f32 0.01, %v997_v44  ;;  %v645_v50 = vadd.f32 %v2258_v38, %v644_v46 }
 0x1b5   : > { %v752_v53 = vmul.f32 0.01, %v645_v50  ;;  %v1195_v54 = vmax.f32 %v997_v44, %v1131_v48 }
 0x1b7   : > { %v816_v45 = vmax.f32 %v645_v50, %v752_v53  ;;  %v1250_v59 = vpack.c.bf16 %v1195_v54, %v1194_v52 }
 0x1b8   : > { %v999_v60 = vpop.f32.mrf.mxu1 }
 0x1b9   : > { %1390 = vmatmul.bf16.gmra.mxu2 %v1250_v59  ;;  %v862_v62 = vpack.c.bf16 %v816_v45, %v815_v58  ;;  %v1000_v5 = vadd.f32 %v2356_v26, %v999_v60 }
 0x1ba   : > { %v647_v0 = vpop.f32.mrf.mxu0 }
 0x1bb   : > { %1038 = vmatmul.bf16.gmra.mxu1 %v862_v62  ;;  %v648_v51 = vadd.f32 %v2258_v38, %v647_v0  ;;  %v1132_v9 = vmul.f32 0.01, %v1000_v5 }
 0x1bc   : > { %v1351_v6 = vpop.f32.mrf.mxu2 }
 0x1bd   : > { %1873 = vmatmul.msk.bf16.gmra.mxu0 %vm451_vm0, %v425_v63  ;;  %v1352_v10 = vadd.f32 %v2434_v8, %v1351_v6  ;;  %v753_v13 = vmul.f32 0.01, %v648_v51  ;;  %v1196_v16 = vmax.f32 %v1000_v5, %v1132_v9  ;;  %v430_v5 = vpack.c.bf16 %v398_v49, %v397_v4 }
 0x1bf   : > { %v1511_v18 = vmul.f32 0.01, %v1352_v10  ;;  %v817_v23 = vmax.f32 %v648_v51, %v753_v13 }
 0x1c0   : > { %v1001_v55 = vpop.f32.mrf.mxu1  ;;  %1878 = vmatmul.msk.bf16.gmra.mxu3 %vm451_vm0, %v430_v5 }
 0x1c1   : > { %v1002_v11 = vadd.f32 %v2356_v26, %v1001_v55  ;;  %v1575_v29 = vmax.f32 %v1352_v10, %v1511_v18 }
 0x1c2   : > { %v649_v12 = vpop.f32.mrf.mxu0 }
 0x1c3   : > { %v1133_v14 = vmul.f32 0.01, %v1002_v11  ;;  %v650_v15 = vadd.f32 %v2258_v38, %v649_v12 }
 0x1c4   : > { %v1353_v17 = vpop.f32.mrf.mxu2 }
 0x1c5   : > { %v754_v19 = vmul.f32 0.01, %v650_v15  ;;  %v1354_v61 = vadd.f32 %v2434_v8, %v1353_v17  ;;  %v1197_v20 = vmax.f32 %v1002_v11, %v1133_v14 }
 0x1c7   : > { %v818_v24 = vmax.f32 %v650_v15, %v754_v19  ;;  %v1512_v25 = vmul.f32 0.01, %v1354_v61  ;;  %v1251_v27 = vpack.c.bf16 %v1197_v20, %v1196_v16 }
 0x1c8   : > { %v1004_v28 = vpop.f32.mrf.mxu1 }
 0x1c9   : > { %v1576_v1 = vmax.f32 %v1354_v61, %v1512_v25  ;;  %1395 = vmatmul.bf16.gmra.mxu2 %v1251_v27  ;;  %v863_v30 = vpack.c.bf16 %v818_v24, %v817_v23  ;;  %v1005_v37 = vadd.f32 %v2356_v26, %v1004_v28 }
 0x1ca   : > { %v652_v32 = vpop.f32.mrf.mxu0 }
 0x1cb   : > { %1043 = vmatmul.bf16.gmra.mxu1 %v863_v30  ;;  %v2451_v36 = vpack.c.bf16 %v1576_v1, %v1575_v29  ;;  %v653_v3 = vadd.f32 %v2258_v38, %v652_v32  ;;  %v1134_v40 = vmul.f32 0.01, %v1005_v37 }
 0x1cc   : > { %v1356_v39 = vpop.f32.mrf.mxu2 }
 0x1cd   : > { %1874 = vmatmul.msk.bf16.gmra.mxu0 %vm451_vm0, %v426_v31  ;;  %v1357_v42 = vadd.f32 %v2434_v8, %v1356_v39  ;;  %v755_v46 = vmul.f32 0.01, %v653_v3  ;;  %v1198_v48 = vmax.f32 %v1005_v37, %v1134_v40 }
 0x1cf   : > { %v1513_v52 = vmul.f32 0.01, %v1357_v42  ;;  %v819_v57 = vmax.f32 %v653_v3, %v755_v46 }
 0x1d0   : > { %v1006_v41 = vpop.f32.mrf.mxu1 }
 0x1d1   : > { %v1007_v43 = vadd.f32 %v2356_v26, %v1006_v41  ;;  %v1577_v62 = vmax.f32 %v1357_v42, %v1513_v52 }
 0x1d2   : > { %v654_v44 = vpop.f32.mrf.mxu0 }
 0x1d3   : > { %v1135_v7 = vmul.f32 0.01, %v1007_v43  ;;  %v655_v47 = vadd.f32 %v2258_v38, %v654_v44 }
 0x1d4   : > { %v1358_v50 = vpop.f32.mrf.mxu2 }
 0x1d5   : > { %v756_v53 = vmul.f32 0.01, %v655_v47  ;;  %v1359_v54 = vadd.f32 %v2434_v8, %v1358_v50  ;;  %v1199_v56 = vmax.f32 %v1007_v43, %v1135_v7 }
 0x1d7   : > { %v820_v58 = vmax.f32 %v655_v47, %v756_v53  ;;  %v1514_v45 = vmul.f32 0.01, %v1359_v54  ;;  %v1252_v59 = vpack.c.bf16 %v1199_v56, %v1198_v48 }
 0x1d8   : > { %v1009_v60 = vpop.f32.mrf.mxu1 }
 0x1d9   : > { %v1578_v63 = vmax.f32 %v1359_v54, %v1514_v45  ;;  %1400 = vmatmul.bf16.gmra.mxu2 %v1252_v59  ;;  %v864_v0 = vpack.c.bf16 %v820_v58, %v819_v57  ;;  %v1010_v51 = vadd.f32 %v2356_v26, %v1009_v60 }
 0x1da   : > { %v657_v2 = vpop.f32.mrf.mxu0 }
 0x1db   : > { %1048 = vmatmul.bf16.gmra.mxu1 %v864_v0  ;;  %v2463_v6 = vpack.c.bf16 %v1578_v63, %v1577_v62  ;;  %v658_v55 = vadd.f32 %v2258_v38, %v657_v2  ;;  %v1136_v10 = vmul.f32 0.01, %v1010_v51 }
 0x1dc   : > { %v1361_v9 = vpop.f32.mrf.mxu2 }
 0x1dd   : > { %v1362_v12 = vadd.f32 %v2434_v8, %v1361_v9  ;;  %v757_v15 = vmul.f32 0.01, %v658_v55  ;;  %v1200_v18 = vmax.f32 %v1010_v51, %v1136_v10 }
 0x1df   : > { %v1515_v61 = vmul.f32 0.01, %v1362_v12  ;;  %v821_v23 = vmax.f32 %v658_v55, %v757_v15 }
 0x1e0   : > { %v1011_v11 = vpop.f32.mrf.mxu1 }
 0x1e1   : > { %v1012_v13 = vadd.f32 %v2356_v26, %v1011_v11  ;;  %v1579_v29 = vmax.f32 %v1362_v12, %v1515_v61  ;;  %v2489_v12 = vld [vmem:[%s2706_s2] ss:$0 sm:$0xff] }
 0x1e2   : > { %v659_v14 = vpop.f32.mrf.mxu0 }
 0x1e3   : > { %v1137_v16 = vmul.f32 0.01, %v1012_v13  ;;  %v660_v17 = vadd.f32 %v2258_v38, %v659_v14 }
 0x1e4   : > { %v1363_v19 = vpop.f32.mrf.mxu2 }
 0x1e5   : > { %v758_v20 = vmul.f32 0.01, %v660_v17  ;;  %v1364_v21 = vadd.f32 %v2434_v8, %v1363_v19  ;;  %v1201_v22 = vmax.f32 %v1012_v13, %v1137_v16 }
 0x1e7   : > { %v822_v24 = vmax.f32 %v660_v17, %v758_v20  ;;  %v1516_v25 = vmul.f32 0.01, %v1364_v21  ;;  %v1253_v27 = vpack.c.bf16 %v1201_v22, %v1200_v18 }
 0x1e8   : > { %v1014_v28 = vpop.f32.mrf.mxu1 }
 0x1e9   : > { %v1580_v1 = vmax.f32 %v1364_v21, %v1516_v25  ;;  %1405 = vmatmul.bf16.gmra.mxu2 %v1253_v27  ;;  %v865_v30 = vpack.c.bf16 %v822_v24, %v821_v23  ;;  %v1015_v33 = vadd.f32 %v2356_v26, %v1014_v28 }
 0x1ea   : > { %v662_v31 = vpop.f32.mrf.mxu0 }
 0x1eb   : > { %1053 = vmatmul.bf16.gmra.mxu1 %v865_v30  ;;  %v2472_v32 = vpack.c.bf16 %v1580_v1, %v1579_v29  ;;  %v663_v35 = vadd.f32 %v2258_v38, %v662_v31  ;;  %v1138_v37 = vmul.f32 0.01, %v1015_v33 }
 0x1ec   : > { %v1366_v34 = vpop.f32.mrf.mxu2 }
 0x1ed   : > { %v1367_v3 = vadd.f32 %v2434_v8, %v1366_v34  ;;  %v759_v42 = vmul.f32 0.01, %v663_v35  ;;  %v1202_v46 = vmax.f32 %v1015_v33, %v1138_v37 }
 0x1ef   : > { %v1517_v47 = vmul.f32 0.01, %v1367_v3  ;;  %v823_v53 = vmax.f32 %v663_v35, %v759_v42 }
 0x1f0   : > { %v1016_v39 = vpop.f32.mrf.mxu1 }
 0x1f1   : > { %v1017_v40 = vadd.f32 %v2356_v26, %v1016_v39  ;;  %v1581_v45 = vmax.f32 %v1367_v3, %v1517_v47 }
 0x1f2   : > { %v664_v41 = vpop.f32.mrf.mxu0 }
 0x1f3   : > { %v1139_v43 = vmul.f32 0.01, %v1017_v40  ;;  %v665_v44 = vadd.f32 %v2258_v38, %v664_v41 }
 0x1f4   : > { %v1368_v7 = vpop.f32.mrf.mxu2 }
 0x1f5   : > { %v1203_v48 = vmax.f32 %v1017_v40, %v1139_v43  ;;  %v760_v50 = vmul.f32 0.01, %v665_v44  ;;  %v1369_v52 = vadd.f32 %v2434_v8, %v1368_v7 }
 0x1f7   : > { %v824_v54 = vmax.f32 %v665_v44, %v760_v50  ;;  %v1518_v56 = vmul.f32 0.01, %v1369_v52  ;;  %v1254_v57 = vpack.c.bf16 %v1203_v48, %v1202_v46 }
 0x1f8   : > { %v1019_v58 = vpop.f32.mrf.mxu1 }
 0x1f9   : > { %v1582_v59 = vmax.f32 %v1369_v52, %v1518_v56  ;;  %1410 = vmatmul.bf16.gmra.mxu2 %v1254_v57  ;;  %v866_v60 = vpack.c.bf16 %v824_v54, %v823_v53  ;;  %v1020_v0 = vadd.f32 %v2356_v26, %v1019_v58 }
 0x1fa   : > { %v667_v62 = vpop.f32.mrf.mxu0 }
 0x1fb   : > { %1058 = vmatmul.bf16.gmra.mxu1 %v866_v60  ;;  %v2480_v63 = vpack.c.bf16 %v1582_v59, %v1581_v45  ;;  %v668_v4 = vadd.f32 %v2258_v38, %v667_v62  ;;  %v1140_v49 = vmul.f32 0.01, %v1020_v0 }
 0x1fc   : > { %v1371_v2 = vpop.f32.mrf.mxu2 }
 0x1fd   : > { %v1372_v51 = vadd.f32 %v2434_v8, %v1371_v2  ;;  %v761_v10 = vmul.f32 0.01, %v668_v4  ;;  %v1204_v14 = vmax.f32 %v1020_v0, %v1140_v49 }
 0x1ff   : > { %v1519_v16 = vmul.f32 0.01, %v1372_v51  ;;  %v825_v19 = vmax.f32 %v668_v4, %v761_v10 }
 0x200   : > { %v1021_v5 = vpop.f32.mrf.mxu1 }
 0x201   : > { %v1022_v9 = vadd.f32 %v2356_v26, %v1021_v5  ;;  %v1583_v23 = vmax.f32 %v1372_v51, %v1519_v16 }
 0x202   : > { %v669_v55 = vpop.f32.mrf.mxu0 }
 0x203   : > { %v1141_v11 = vmul.f32 0.01, %v1022_v9  ;;  %v670_v13 = vadd.f32 %v2489_v12, %v669_v55 }
 0x204   : > { %v1373_v15 = vpop.f32.mrf.mxu2 }
 0x205   : > { %v1205_v38 = vmax.f32 %v1022_v9, %v1141_v11  ;;  %v762_v17 = vmul.f32 0.01, %v670_v13  ;;  %v1374_v18 = vadd.f32 %v2434_v8, %v1373_v15 }
 0x207   : > { %v826_v61 = vmax.f32 %v670_v13, %v762_v17  ;;  %v1520_v20 = vmul.f32 0.01, %v1374_v18  ;;  %v1255_v21 = vpack.c.bf16 %v1205_v38, %v1204_v14 }
 0x208   : > { %v1024_v22 = vpop.f32.mrf.mxu1 }
 0x209   : > { %v1584_v24 = vmax.f32 %v1374_v18, %v1520_v20  ;;  %1415 = vmatmul.bf16.gmra.mxu2 %v1255_v21  ;;  %v867_v25 = vpack.c.bf16 %v826_v61, %v825_v19  ;;  %v1025_v29 = vadd.f32 %v2356_v26, %v1024_v22 }
 0x20a   : > { %v672_v27 = vpop.f32.mrf.mxu0 }
 0x20b   : > { %1063 = vmatmul.bf16.gmra.mxu1 %v867_v25  ;;  %v2493_v28 = vpack.c.bf16 %v1584_v24, %v1583_v23  ;;  %v673_v30 = vadd.f32 %v2489_v12, %v672_v27  ;;  %v1142_v31 = vmul.f32 0.01, %v1025_v29 }
 0x20c   : > { %v1376_v1 = vpop.f32.mrf.mxu2 }
 0x20d   : > { %v1377_v34 = vadd.f32 %v2434_v8, %v1376_v1  ;;  %v763_v39 = vmul.f32 0.01, %v673_v30  ;;  %v1206_v41 = vmax.f32 %v1025_v29, %v1142_v31 }
 0x20f   : > { %v1521_v43 = vmul.f32 0.01, %v1377_v34  ;;  %v827_v47 = vmax.f32 %v673_v30, %v763_v39 }
 0x210   : > { %v1026_v33 = vpop.f32.mrf.mxu1 }
 0x211   : > { %v1027_v35 = vadd.f32 %v2356_v26, %v1026_v33  ;;  %v1585_v54 = vmax.f32 %v1377_v34, %v1521_v43 }
 0x212   : > { %v674_v37 = vpop.f32.mrf.mxu0 }
 0x213   : > { %v1143_v3 = vmul.f32 0.01, %v1027_v35  ;;  %v675_v40 = vadd.f32 %v2489_v12, %v674_v37 }
 0x214   : > { %v1378_v42 = vpop.f32.mrf.mxu2 }
 0x215   : > { %v1207_v44 = vmax.f32 %v1027_v35, %v1143_v3  ;;  %v764_v46 = vmul.f32 0.01, %v675_v40  ;;  %v1379_v7 = vadd.f32 %v2434_v8, %v1378_v42 }
 0x217   : > { %v828_v48 = vmax.f32 %v675_v40, %v764_v46  ;;  %v1522_v50 = vmul.f32 0.01, %v1379_v7  ;;  %v1256_v52 = vpack.c.bf16 %v1207_v44, %v1206_v41 }
 0x218   : > { %v1029_v53 = vpop.f32.mrf.mxu1 }
 0x219   : > { %v1586_v56 = vmax.f32 %v1379_v7, %v1522_v50  ;;  %1420 = vmatmul.bf16.gmra.mxu2 %v1256_v52  ;;  %v868_v57 = vpack.c.bf16 %v828_v48, %v827_v47  ;;  %v1030_v60 = vadd.f32 %v2356_v26, %v1029_v53 }
 0x21a   : > { %v677_v58 = vpop.f32.mrf.mxu0 }
 0x21b   : > { %1068 = vmatmul.bf16.gmra.mxu1 %v868_v57  ;;  %v2501_v45 = vpack.c.bf16 %v1586_v56, %v1585_v54  ;;  %v678_v62 = vadd.f32 %v2489_v12, %v677_v58  ;;  %v1144_v2 = vmul.f32 0.01, %v1030_v60  ;;  %v697_v54 = vpop.f32.mrf.mxu3 }
 0x21c   : > { %v2503_v59 = vpop.f32.mrf.mxu2 }
 0x21d   : > { %v765_v5 = vmul.f32 0.01, %v678_v62  ;;  %v1208_v10 = vmax.f32 %v1030_v60, %v1144_v2 }
 0x21f   : > { %v829_v14 = vmax.f32 %v678_v62, %v765_v5 }
 0x220   : > { %v1031_v0 = vpop.f32.mrf.mxu1 }
 0x221   : > { %v1032_v4 = vadd.f32 %v2356_v26, %v1031_v0 }
 0x222   : > { %v679_v49 = vpop.f32.mrf.mxu0 }
 0x223   : > { %v1145_v51 = vmul.f32 0.01, %v1032_v4  ;;  %v680_v9 = vadd.f32 %v2489_v12, %v679_v49 }
 0x224   : > { %v2509_v55 = vpop.f32.mrf.mxu2 }
 0x225   : > { %v1209_v11 = vmax.f32 %v1032_v4, %v1145_v51  ;;  %v766_v13 = vmul.f32 0.01, %v680_v9 }
 0x227   : > { %v830_v15 = vmax.f32 %v680_v9, %v766_v13  ;;  %v1257_v16 = vpack.c.bf16 %v1209_v11, %v1208_v10 }
 0x228   : > { %v1034_v38 = vpop.f32.mrf.mxu1 }
 0x229   : > { %1425 = vmatmul.bf16.gmra.mxu2 %v1257_v16  ;;  %v869_v17 = vpack.c.bf16 %v830_v15, %v829_v14  ;;  %v1035_v61 = vadd.f32 %v2356_v26, %v1034_v38  ;;  %v699_v38 = vpop.f32.mrf.mxu3 }
 0x22a   : > { %v682_v18 = vpop.f32.mrf.mxu0 }
 0x22b   : > { %1073 = vmatmul.bf16.gmra.mxu1 %v869_v17  ;;  %v683_v20 = vadd.f32 %v2489_v12, %v682_v18  ;;  %v1146_v22 = vmul.f32 0.01, %v1035_v61 }
 0x22c   : > { %v1386_v19 = vpop.f32.mrf.mxu2 }
 0x22d   : > { %v767_v25 = vmul.f32 0.01, %v683_v20  ;;  %v1210_v30 = vmax.f32 %v1035_v61, %v1146_v22  ;;  %v1387_v61 = vadd.f32 %v2434_v8, %v1386_v19 }
 0x22f   : > { %v831_v34 = vmax.f32 %v683_v20, %v767_v25 }
 0x230   : > { %v1036_v21 = vpop.f32.mrf.mxu1 }
 0x231   : > { %v1037_v23 = vadd.f32 %v2356_v26, %v1036_v21 }
 0x232   : > { %v684_v24 = vpop.f32.mrf.mxu0 }
 0x233   : > { %v1147_v27 = vmul.f32 0.01, %v1037_v23  ;;  %v685_v29 = vadd.f32 %v2489_v12, %v684_v24 }
 0x234   : > { %v1388_v1 = vpop.f32.mrf.mxu2 }
 0x235   : > { %v1211_v31 = vmax.f32 %v1037_v23, %v1147_v27  ;;  %v768_v33 = vmul.f32 0.01, %v685_v29  ;;  %v1389_v17 = vadd.f32 %v2434_v8, %v1388_v1 }
 0x237   : > { %v832_v35 = vmax.f32 %v685_v29, %v768_v33  ;;  %v1258_v37 = vpack.c.bf16 %v1211_v31, %v1210_v30  ;;  %v1526_v24 = vmul.f32 0.01, %v1389_v17  ;;  %v1525_v31 = vmul.f32 0.01, %v1387_v61 }
 0x238   : > { %v1039_v39 = vpop.f32.mrf.mxu1 }
 0x239   : > { %1430 = vmatmul.bf16.gmra.mxu2 %v1258_v37  ;;  %v870_v3 = vpack.c.bf16 %v832_v35, %v831_v34  ;;  %v1040_v41 = vadd.f32 %v2356_v26, %v1039_v39  ;;  %v1384_v39 = vadd.f32 %v2434_v8, %v2509_v55 }
 0x23a   : > { %v687_v40 = vpop.f32.mrf.mxu0 }
 0x23b   : > { %1078 = vmatmul.bf16.gmra.mxu1 %v870_v3  ;;  %v688_v43 = vadd.f32 %v2489_v12, %v687_v40  ;;  %v1148_v44 = vmul.f32 0.01, %v1040_v41  ;;  %v1590_v3 = vmax.f32 %v1389_v17, %v1526_v24 }
 0x23c   : > { %v1391_v42 = vpop.f32.mrf.mxu2 }
 0x23d   : > { %v1392_v7 = vadd.f32 %v2434_v8, %v1391_v42  ;;  %v769_v50 = vmul.f32 0.01, %v688_v43  ;;  %v1212_v56 = vmax.f32 %v1040_v41, %v1148_v44  ;;  %v1382_v44 = vadd.f32 %v2434_v8, %v2503_v59  ;;  %v2542_v59 = vld [vmem:[%s2708_s4] ss:$0 sm:$0xff] }
 0x23f   : > { %v1527_v58 = vmul.f32 0.01, %v1392_v7  ;;  %v833_v2 = vmax.f32 %v688_v43, %v769_v50  ;;  %v702_v43 = vpop.f32.mrf.mxu3  ;;  %v1523_v55 = vmul.f32 0.01, %v1382_v44 }
 0x240   : > { %v1041_v46 = vpop.f32.mrf.mxu1 }
 0x241   : > { %v1042_v47 = vadd.f32 %v2356_v26, %v1041_v46  ;;  %v1591_v9 = vmax.f32 %v1392_v7, %v1527_v58  ;;  %v1589_v46 = vmax.f32 %v1387_v61, %v1525_v31  ;;  %v700_v58 = vadd.f32 %v2489_v12, %v699_v38 }
 0x242   : > { %v689_v48 = vpop.f32.mrf.mxu0  ;;  %v703_v31 = vadd.f32 %v2489_v12, %v702_v43 }
 0x243   : > { %v1149_v52 = vmul.f32 0.01, %v1042_v47  ;;  %v690_v53 = vadd.f32 %v2489_v12, %v689_v48 }
 0x244   : > { %v1393_v57 = vpop.f32.mrf.mxu2 }
 0x245   : > { %v1213_v60 = vmax.f32 %v1042_v47, %v1149_v52  ;;  %v770_v62 = vmul.f32 0.01, %v690_v53  ;;  %v1394_v0 = vadd.f32 %v2434_v8, %v1393_v57  ;;  %v1524_v52 = vmul.f32 0.01, %v1384_v39 }
 0x246   : > { %v698_v57 = vadd.f32 %v2489_v12, %v697_v54 }
 0x247   : > { %v834_v4 = vmax.f32 %v690_v53, %v770_v62  ;;  %v1528_v49 = vmul.f32 0.01, %v1394_v0  ;;  %v1259_v5 = vpack.c.bf16 %v1213_v60, %v1212_v56  ;;  %v1647_v53 = vpack.c.bf16 %v1590_v3, %v1589_v46 }
 0x248   : > { %v1044_v51 = vpop.f32.mrf.mxu1 }
 0x249   : > { %v1592_v10 = vmax.f32 %v1394_v0, %v1528_v49  ;;  %1435 = vmatmul.bf16.gmra.mxu2 %v1259_v5  ;;  %v871_v11 = vpack.c.bf16 %v834_v4, %v833_v2  ;;  %v1045_v15 = vadd.f32 %v2356_v26, %v1044_v51  ;;  %v1588_v0 = vmax.f32 %v1384_v39, %v1524_v52 }
 0x24a   : > { %v692_v13 = vpop.f32.mrf.mxu0  ;;  %v1587_v2 = vmax.f32 %v1382_v44, %v1523_v55  ;;  %v773_v4 = vmul.f32 0.01, %v698_v57  ;;  %v774_v49 = vmul.f32 0.01, %v700_v58 }
 0x24b   : > { %1083 = vmatmul.bf16.gmra.mxu1 %v871_v11  ;;  %v2521_v14 = vpack.c.bf16 %v1592_v10, %v1591_v9  ;;  %v693_v18 = vadd.f32 %v2489_v12, %v692_v13  ;;  %v1150_v20 = vmul.f32 0.01, %v1045_v15  ;;  %v704_v10 = vpop.f32.mrf.mxu3 }
 0x24c   : > { %v1396_v16 = vpop.f32.mrf.mxu2  ;;  %v1646_v11 = vpack.c.bf16 %v1588_v0, %v1587_v2  ;;  %v838_v38 = vmax.f32 %v700_v58, %v774_v49 }
 0x24d   : > { %v1397_v22 = vadd.f32 %v2434_v8, %v1396_v16  ;;  %v771_v27 = vmul.f32 0.01, %v693_v18  ;;  %v1214_v33 = vmax.f32 %v1045_v15, %v1150_v20  ;;  %v837_v15 = vmax.f32 %v698_v57, %v773_v4 }
 0x24f   : > { %v1529_v1 = vmul.f32 0.01, %v1397_v22  ;;  %v835_v40 = vmax.f32 %v693_v18, %v771_v27  ;;  %v873_v27 = vpack.c.bf16 %v838_v38, %v837_v15 }
 0x250   : > { %v1046_v21 = vpop.f32.mrf.mxu1 }
 0x251   : > { %v1047_v23 = vadd.f32 %v2356_v26, %v1046_v21  ;;  %v1593_v47 = vmax.f32 %v1397_v22, %v1529_v1 }
 0x252   : > { %v694_v25 = vpop.f32.mrf.mxu0 }
 0x253   : > { %v1151_v29 = vmul.f32 0.01, %v1047_v23  ;;  %v695_v30 = vadd.f32 %v2489_v12, %v694_v25 }
 0x254   : > { %v1398_v34 = vpop.f32.mrf.mxu2 }
 0x255   : > { %v1215_v35 = vmax.f32 %v1047_v23, %v1151_v29  ;;  %v772_v37 = vmul.f32 0.01, %v695_v30  ;;  %v1399_v19 = vadd.f32 %v2434_v8, %v1398_v34  ;;  %v707_v29 = vpop.f32.mrf.mxu3 }
 0x257   : > { %v836_v26 = vmax.f32 %v695_v30, %v772_v37  ;;  %v1530_v41 = vmul.f32 0.01, %v1399_v19  ;;  %v1260_v42 = vpack.c.bf16 %v1215_v35, %v1214_v33  ;;  %v705_v33 = vadd.f32 %v2489_v12, %v704_v10 }
 0x258   : > { %v1049_v7 = vpop.f32.mrf.mxu1  ;;  %v775_v35 = vmul.f32 0.01, %v703_v31 }
 0x259   : > { %v1594_v48 = vmax.f32 %v1399_v19, %v1530_v41  ;;  %1440 = vmatmul.bf16.gmra.mxu2 %v1260_v42  ;;  %v872_v50 = vpack.c.bf16 %v836_v26, %v835_v40  ;;  %v1050_v62 = vadd.f32 %v2542_v59, %v1049_v7  ;;  %v776_v37 = vmul.f32 0.01, %v705_v33 }
 0x25a   : > { %v839_v41 = vmax.f32 %v703_v31, %v775_v35 }
 0x25b   : > { %1088 = vmatmul.bf16.vlgmr.msrb.gmra.mxu3 %v872_v50  ;;  %v2535_v56 = vpack.c.bf16 %v1594_v48, %v1593_v47  ;;  %v1152_v51 = vmul.f32 0.01, %v1050_v62  ;;  %v840_v43 = vmax.f32 %v705_v33, %v776_v37 }
 0x25c   : > { %1672 = vmatpush.bf16.xpose.msrb.mxu3 %v1647_v53  ;;  %v1401_v60 = vpop.f32.mrf.mxu2 }
 0x25d   : > { %v1402_v9 = vadd.f32 %v2434_v8, %v1401_v60  ;;  %v1216_v17 = vmax.f32 %v1050_v62, %v1152_v51  ;;  %v709_v47 = vpop.f32.mrf.mxu3  ;;  %v874_v57 = vpack.c.bf16 %v840_v43, %v839_v41 }
 0x25e   : > { %v710_v60 = vadd.f32 %v2489_v12, %v709_v47 }
 0x25f   : > { %v1531_v18 = vmul.f32 0.01, %v1402_v9 }
 0x260   : > { %v1051_v5 = vpop.f32.mrf.mxu1  ;;  %v778_v49 = vmul.f32 0.01, %v710_v60 }
 0x261   : > { %v1052_v54 = vadd.f32 %v2542_v59, %v1051_v5  ;;  %v1595_v24 = vmax.f32 %v1402_v9, %v1531_v18 }
 0x262   : > { %v842_v15 = vmax.f32 %v710_v60, %v778_v49 }
 0x263   : > { %v1153_v13 = vmul.f32 0.01, %v1052_v54 }
 0x264   : > { %1673 = vmatpush.bf16.xpose.msrb.mxu3 %v1646_v11  ;;  %v1403_v16 = vpop.f32.mrf.mxu2 }
 0x265   : > { %v1217_v61 = vmax.f32 %v1052_v54, %v1153_v13  ;;  %v1404_v20 = vadd.f32 %v2434_v8, %v1403_v16  ;;  %v712_v2 = vpop.f32.mrf.mxu3 }
 0x267   : > { %v1532_v21 = vmul.f32 0.01, %v1404_v20  ;;  %v1261_v22 = vpack.c.bf16 %v1217_v61, %v1216_v17 }
 0x268   : > { %v1054_v23 = vpop.f32.mrf.mxu1 }
 0x269   : > { %v1596_v25 = vmax.f32 %v1404_v20, %v1532_v21  ;;  %1445 = vmatmul.bf16.gmra.mxu2 %v1261_v22  ;;  %v1055_v1 = vadd.f32 %v2542_v59, %v1054_v23 }
 0x26b   : > { %1093 = vmatmul.bf16.gmra.mxu3 %v873_v27  ;;  %v2548_v30 = vpack.c.bf16 %v1596_v25, %v1595_v24  ;;  %v1154_v39 = vmul.f32 0.01, %v1055_v1 }
 0x26c   : > { %1674 = vmatpush.bf16.xpose.msrb.mxu3 %v2501_v45  ;;  %v1406_v34 = vpop.f32.mrf.mxu2 }
 0x26d   : > { %v1407_v3 = vadd.f32 %v2434_v8, %v1406_v34  ;;  %v1218_v44 = vmax.f32 %v1055_v1, %v1154_v39  ;;  %v714_v23 = vpop.f32.mrf.mxu3 }
 0x26e   : > { %v715_v27 = vadd.f32 %v2489_v12, %v714_v23 }
 0x26f   : > { %v1533_v46 = vmul.f32 0.01, %v1407_v3 }
 0x270   : > { %v1056_v19 = vpop.f32.mrf.mxu1  ;;  %v780_v34 = vmul.f32 0.01, %v715_v27 }
 0x271   : > { %v1057_v40 = vadd.f32 %v2542_v59, %v1056_v19  ;;  %v1597_v53 = vmax.f32 %v1407_v3, %v1533_v46 }
 0x273   : > { %v1155_v26 = vmul.f32 0.01, %v1057_v40 }
 0x274   : > { %1675 = vmatpush.bf16.xpose.msrb.mxu3 %v2493_v28  ;;  %v1408_v42 = vpop.f32.mrf.mxu2  ;;  %v708_v28 = vadd.f32 %v2489_v12, %v707_v29 }
 0x275   : > { %v1219_v45 = vmax.f32 %v1057_v40, %v1155_v26  ;;  %v1409_v7 = vadd.f32 %v2434_v8, %v1408_v42  ;;  %v844_v26 = vmax.f32 %v715_v27, %v780_v34 }
 0x276   : > { %v777_v4 = vmul.f32 0.01, %v708_v28 }
 0x277   : > { %v1534_v48 = vmul.f32 0.01, %v1409_v7  ;;  %v1262_v50 = vpack.c.bf16 %v1219_v45, %v1218_v44 }
 0x278   : > { %v1059_v52 = vpop.f32.mrf.mxu1  ;;  %v841_v11 = vmax.f32 %v708_v28, %v777_v4 }
 0x279   : > { %v1598_v55 = vmax.f32 %v1409_v7, %v1534_v48  ;;  %1450 = vmatmul.bf16.gmra.mxu2 %v1262_v50  ;;  %v1060_v0 = vadd.f32 %v2542_v59, %v1059_v52 }
 0x27a   : > { %v875_v24 = vpack.c.bf16 %v842_v15, %v841_v11 }
 0x27b   : > { %1098 = vmatmul.bf16.gmra.mxu3 %v874_v57  ;;  %v2558_v58 = vpack.c.bf16 %v1598_v55, %v1597_v53  ;;  %v1156_v51 = vmul.f32 0.01, %v1060_v0 }
 0x27c   : > { %1676 = vmatpush.bf16.xpose.msrb.mxu3 %v2480_v63  ;;  %v1411_v62 = vpop.f32.mrf.mxu2 }
 0x27d   : > { %v1412_v9 = vadd.f32 %v2434_v8, %v1411_v62  ;;  %v1220_v16 = vmax.f32 %v1060_v0, %v1156_v51 }
 0x27f   : > { %v1535_v63 = vmul.f32 0.01, %v1412_v9 }
 0x280   : > { %v1061_v5 = vpop.f32.mrf.mxu1 }
 0x281   : > { %v1062_v54 = vadd.f32 %v2542_v59, %v1061_v5  ;;  %v1599_v21 = vmax.f32 %v1412_v9, %v1535_v63 }
 0x283   : > { %v1157_v10 = vmul.f32 0.01, %v1062_v54 }
 0x284   : > { %1677 = vmatpush.bf16.xpose.msrb.mxu3 %v2472_v32  ;;  %v1413_v13 = vpop.f32.mrf.mxu2  ;;  %v713_v32 = vadd.f32 %v2489_v12, %v712_v2 }
 0x285   : > { %v1221_v38 = vmax.f32 %v1062_v54, %v1157_v10  ;;  %v1414_v17 = vadd.f32 %v2434_v8, %v1413_v13 }
 0x286   : > { %v779_v33 = vmul.f32 0.01, %v713_v32 }
 0x287   : > { %v1536_v18 = vmul.f32 0.01, %v1414_v17  ;;  %v1263_v61 = vpack.c.bf16 %v1221_v38, %v1220_v16 }
 0x288   : > { %v1064_v20 = vpop.f32.mrf.mxu1  ;;  %v843_v3 = vmax.f32 %v713_v32, %v779_v33 }
 0x289   : > { %v1600_v22 = vmax.f32 %v1414_v17, %v1536_v18  ;;  %1455 = vmatmul.bf16.gmra.mxu2 %v1263_v61  ;;  %v1065_v31 = vadd.f32 %v2542_v59, %v1064_v20 }
 0x28a   : > { %v876_v47 = vpack.c.bf16 %v844_v26, %v843_v3 }
 0x28b   : > { %1103 = vmatmul.bf16.gmra.mxu3 %v875_v24  ;;  %v2568_v25 = vpack.c.bf16 %v1600_v22, %v1599_v21  ;;  %v1158_v35 = vmul.f32 0.01, %v1065_v31 }
 0x28c   : > { %1678 = vmatpush.bf16.xpose.msrb.mxu3 %v2463_v6  ;;  %v1416_v29 = vpop.f32.mrf.mxu2 }
 0x28d   : > { %v1417_v37 = vadd.f32 %v2434_v8, %v1416_v29  ;;  %v1222_v12 = vmax.f32 %v1065_v31, %v1158_v35 }
 0x28f   : > { %v1537_v41 = vmul.f32 0.01, %v1417_v37 }
 0x290   : > { %v1066_v1 = vpop.f32.mrf.mxu1 }
 0x291   : > { %v1067_v19 = vadd.f32 %v2542_v59, %v1066_v1  ;;  %v1601_v45 = vmax.f32 %v1417_v37, %v1537_v41 }
 0x293   : > { %v1159_v39 = vmul.f32 0.01, %v1067_v19 }
 0x294   : > { %1679 = vmatpush.bf16.xpose.msrb.mxu3 %v2451_v36  ;;  %v1418_v40 = vpop.f32.mrf.mxu2 }
 0x295   : > { %v1223_v6 = vmax.f32 %v1067_v19, %v1159_v39  ;;  %v1419_v42 = vadd.f32 %v2434_v8, %v1418_v40 }
 0x297   : > { %v1538_v43 = vmul.f32 0.01, %v1419_v42  ;;  %v1264_v44 = vpack.c.bf16 %v1223_v6, %v1222_v12 }
 0x298   : > { %v1069_v46 = vpop.f32.mrf.mxu1 }
 0x299   : > { %v1602_v7 = vmax.f32 %v1419_v42, %v1538_v43  ;;  %1460 = vmatmul.bf16.gmra.mxu2 %v1264_v44  ;;  %v1070_v36 = vadd.f32 %v2542_v59, %v1069_v46 }
 0x29b   : > { %1108 = vmatmul.bf16.gmra.mxu3 %v876_v47  ;;  %v2578_v48 = vpack.c.bf16 %v1602_v7, %v1601_v45  ;;  %v1160_v53 = vmul.f32 0.01, %v1070_v36 }
 0x29c   : > { %v1421_v50 = vpop.f32.mrf.mxu2 }
 0x29d   : > { %v1422_v55 = vadd.f32 %v2434_v8, %v1421_v50  ;;  %v1224_v62 = vmax.f32 %v1070_v36, %v1160_v53 }
 0x29f   : > { %v1539_v0 = vmul.f32 0.01, %v1422_v55 }
 0x2a0   : > { %v1071_v52 = vpop.f32.mrf.mxu1 }
 0x2a1   : > { %v1072_v57 = vadd.f32 %v2542_v59, %v1071_v52  ;;  %v1603_v9 = vmax.f32 %v1422_v55, %v1539_v0 }
 0x2a3   : > { %v1161_v28 = vmul.f32 0.01, %v1072_v57 }
 0x2a4   : > { %v1423_v60 = vpop.f32.mrf.mxu2 }
 0x2a5   : > { %v1225_v2 = vmax.f32 %v1072_v57, %v1161_v28  ;;  %v1424_v4 = vadd.f32 %v2434_v8, %v1423_v60 }
 0x2a7   : > { %v1540_v49 = vmul.f32 0.01, %v1424_v4  ;;  %v1265_v5 = vpack.c.bf16 %v1225_v2, %v1224_v62 }
 0x2a8   : > { %v1074_v51 = vpop.f32.mrf.mxu1 }
 0x2a9   : > { %v1604_v54 = vmax.f32 %v1424_v4, %v1540_v49  ;;  %1465 = vmatmul.bf16.gmra.mxu2 %v1265_v5  ;;  %v1075_v13 = vadd.f32 %v2542_v59, %v1074_v51 }
 0x2ab   : > { %v2584_v10 = vpack.c.bf16 %v1604_v54, %v1603_v9  ;;  %v1162_v16 = vmul.f32 0.01, %v1075_v13 }
 0x2ac   : > { %v1426_v11 = vpop.f32.mrf.mxu2 }
 0x2ad   : > { %v1226_v18 = vmax.f32 %v1075_v13, %v1162_v16  ;;  %v1427_v5 = vadd.f32 %v2434_v8, %v1426_v11 }
 0x2b0   : > { %v1076_v15 = vpop.f32.mrf.mxu1 }
 0x2b1   : > { %v1077_v63 = vadd.f32 %v2542_v59, %v1076_v15 }
 0x2b3   : > { %v1163_v38 = vmul.f32 0.01, %v1077_v63 }
 0x2b4   : > { %v1428_v17 = vpop.f32.mrf.mxu2 }
 0x2b5   : > { %v1227_v61 = vmax.f32 %v1077_v63, %v1163_v38  ;;  %v1429_v4 = vadd.f32 %v2434_v8, %v1428_v17 }
 0x2b7   : > { %v1266_v20 = vpack.c.bf16 %v1227_v61, %v1226_v18  ;;  %v1542_v13 = vmul.f32 0.01, %v1429_v4  ;;  %v1541_v18 = vmul.f32 0.01, %v1427_v5 }
 0x2b8   : > { %v1079_v21 = vpop.f32.mrf.mxu1 }
 0x2b9   : > { %1470 = vmatmul.bf16.gmra.mxu2 %v1266_v20  ;;  %v1080_v23 = vadd.f32 %v2542_v59, %v1079_v21  ;;  %v1605_v11 = vmax.f32 %v1427_v5, %v1541_v18 }
 0x2bb   : > { %v1164_v32 = vmul.f32 0.01, %v1080_v23 }
 0x2bc   : > { %v1431_v22 = vpop.f32.mrf.mxu2 }
 0x2bd   : > { %v1432_v27 = vadd.f32 %v2434_v8, %v1431_v22  ;;  %v1228_v34 = vmax.f32 %v1080_v23, %v1164_v32  ;;  %v1606_v22 = vmax.f32 %v1429_v4, %v1542_v13 }
 0x2bf   : > { %v1543_v1 = vmul.f32 0.01, %v1432_v27 }
 0x2c0   : > { %v1081_v24 = vpop.f32.mrf.mxu1 }
 0x2c1   : > { %v1082_v29 = vadd.f32 %v2542_v59, %v1081_v24  ;;  %v1607_v40 = vmax.f32 %v1432_v27, %v1543_v1 }
 0x2c3   : > { %v1165_v31 = vmul.f32 0.01, %v1082_v29 }
 0x2c4   : > { %v1433_v33 = vpop.f32.mrf.mxu2 }
 0x2c5   : > { %v1229_v35 = vmax.f32 %v1082_v29, %v1165_v31  ;;  %v1434_v37 = vadd.f32 %v2434_v8, %v1433_v33  ;;  %v1655_v29 = vpack.c.bf16 %v1606_v22, %v1605_v11  ;;  %v2611_v31 = vld [vmem:[%s2710_s6] ss:$0 sm:$0xff] }
 0x2c7   : > { %v1544_v19 = vmul.f32 0.01, %v1434_v37  ;;  %v1267_v39 = vpack.c.bf16 %v1229_v35, %v1228_v34 }
 0x2c8   : > { %v1084_v3 = vpop.f32.mrf.mxu1 }
 0x2c9   : > { %v1608_v26 = vmax.f32 %v1434_v37, %v1544_v19  ;;  %1475 = vmatmul.bf16.gmra.mxu2 %v1267_v39  ;;  %v1085_v6 = vadd.f32 %v2542_v59, %v1084_v3 }
 0x2cb   : > { %v2592_v12 = vpack.c.bf16 %v1608_v26, %v1607_v40  ;;  %v1166_v43 = vmul.f32 0.01, %v1085_v6 }
 0x2cc   : > { %v1436_v41 = vpop.f32.mrf.mxu2 }
 0x2cd   : > { %v1437_v44 = vadd.f32 %v2434_v8, %v1436_v41  ;;  %v1230_v47 = vmax.f32 %v1085_v6, %v1166_v43 }
 0x2cf   : > { %v1545_v50 = vmul.f32 0.01, %v1437_v44 }
 0x2d0   : > { %v1086_v42 = vpop.f32.mrf.mxu1 }
 0x2d1   : > { %v1087_v46 = vadd.f32 %v2542_v59, %v1086_v42  ;;  %v1609_v57 = vmax.f32 %v1437_v44, %v1545_v50 }
 0x2d3   : > { %v1167_v45 = vmul.f32 0.01, %v1087_v46 }
 0x2d4   : > { %v1438_v7 = vpop.f32.mrf.mxu2 }
 0x2d5   : > { %v1231_v36 = vmax.f32 %v1087_v46, %v1167_v45  ;;  %v1439_v52 = vadd.f32 %v2434_v8, %v1438_v7 }
 0x2d7   : > { %v1546_v53 = vmul.f32 0.01, %v1439_v52  ;;  %v1268_v55 = vpack.c.bf16 %v1231_v36, %v1230_v47 }
 0x2d9   : > { %v1610_v28 = vmax.f32 %v1439_v52, %v1546_v53  ;;  %1480 = vmatmul.bf16.gmra.mxu2 %v1268_v55 }
 0x2db   : > { %v2598_v60 = vpack.c.bf16 %v1610_v28, %v1609_v57 }
 0x2dc   : > { %v1441_v62 = vpop.f32.mrf.mxu2 }
 0x2dd   : > { %v1442_v2 = vadd.f32 %v2434_v8, %v1441_v62 }
 0x2de   : > { %v1089_v0 = vpop.f32.mrf.mxu3 }
 0x2df   : > { %v1090_v49 = vadd.f32 %v2542_v59, %v1089_v0  ;;  %v1547_v9 = vmul.f32 0.01, %v1442_v2 }
 0x2e1   : > { %v1168_v16 = vmul.f32 0.01, %v1090_v49  ;;  %v1611_v61 = vmax.f32 %v1442_v2, %v1547_v9 }
 0x2e3   : > { %v1232_v17 = vmax.f32 %v1090_v49, %v1168_v16 }
 0x2e4   : > { %v1443_v51 = vpop.f32.mrf.mxu2 }
 0x2e5   : > { %v1444_v54 = vadd.f32 %v2434_v8, %v1443_v51 }
 0x2e6   : > { %v1091_v15 = vpop.f32.mrf.mxu3 }
 0x2e7   : > { %v1548_v63 = vmul.f32 0.01, %v1444_v54  ;;  %v1092_v38 = vadd.f32 %v2542_v59, %v1091_v15 }
 0x2e9   : > { %v1612_v20 = vmax.f32 %v1444_v54, %v1548_v63  ;;  %v1169_v21 = vmul.f32 0.01, %v1092_v38 }
 0x2eb   : > { %v1233_v23 = vmax.f32 %v1092_v38, %v1169_v21  ;;  %v2606_v24 = vpack.c.bf16 %v1612_v20, %v1611_v61 }
 0x2ec   : > { %v1446_v32 = vpop.f32.mrf.mxu2 }
 0x2ed   : > { %v1269_v27 = vpack.c.bf16 %v1233_v23, %v1232_v17  ;;  %v1447_v33 = vadd.f32 %v2611_v31, %v1446_v32 }
 0x2ee   : > { %v1094_v8 = vpop.f32.mrf.mxu3 }
 0x2ef   : > { %1485 = vmatmul.bf16.vlgmr.msra.gmra.mxu3 %v1269_v27  ;;  %v1095_v34 = vadd.f32 %v2542_v59, %v1094_v8  ;;  %v1549_v35 = vmul.f32 0.01, %v1447_v33 }
 0x2f0   : > { %1685 = vmatpush.bf16.xpose.msra.mxu3 %v1655_v29 }
 0x2f1   : > { %v1170_v39 = vmul.f32 0.01, %v1095_v34  ;;  %v1613_v26 = vmax.f32 %v1447_v33, %v1549_v35 }
 0x2f3   : > { %v1234_v42 = vmax.f32 %v1095_v34, %v1170_v39 }
 0x2f4   : > { %v1448_v1 = vpop.f32.mrf.mxu2 }
 0x2f5   : > { %v1449_v37 = vadd.f32 %v2611_v31, %v1448_v1 }
 0x2f6   : > { %v1096_v19 = vpop.f32.mrf.mxu3 }
 0x2f7   : > { %v1550_v3 = vmul.f32 0.01, %v1449_v37  ;;  %v1097_v40 = vadd.f32 %v2542_v59, %v1096_v19 }
 0x2f8   : > { %1686 = vmatpush.bf16.xpose.msra.mxu3 %v2584_v10 }
 0x2f9   : > { %v1614_v41 = vmax.f32 %v1449_v37, %v1550_v3  ;;  %v1171_v6 = vmul.f32 0.01, %v1097_v40 }
 0x2fb   : > { %v1235_v43 = vmax.f32 %v1097_v40, %v1171_v6  ;;  %v2618_v44 = vpack.c.bf16 %v1614_v41, %v1613_v26 }
 0x2fc   : > { %v1451_v46 = vpop.f32.mrf.mxu2 }
 0x2fd   : > { %v1270_v45 = vpack.c.bf16 %v1235_v43, %v1234_v42  ;;  %v1452_v47 = vadd.f32 %v2611_v31, %v1451_v46 }
 0x2fe   : > { %v1099_v7 = vpop.f32.mrf.mxu3 }
 0x2ff   : > { %1490 = vmatmul.bf16.gmra.mxu3 %v1270_v45  ;;  %v1100_v50 = vadd.f32 %v2542_v59, %v1099_v7  ;;  %v1551_v52 = vmul.f32 0.01, %v1452_v47 }
 0x300   : > { %1687 = vmatpush.bf16.xpose.msra.mxu3 %v2578_v48 }
 0x301   : > { %v1172_v55 = vmul.f32 0.01, %v1100_v50  ;;  %v1615_v62 = vmax.f32 %v1452_v47, %v1551_v52 }
 0x303   : > { %v1236_v4 = vmax.f32 %v1100_v50, %v1172_v55 }
 0x304   : > { %v1453_v36 = vpop.f32.mrf.mxu2 }
 0x305   : > { %v1454_v10 = vadd.f32 %v2611_v31, %v1453_v36 }
 0x306   : > { %v1101_v53 = vpop.f32.mrf.mxu3 }
 0x307   : > { %v1552_v57 = vmul.f32 0.01, %v1454_v10  ;;  %v1102_v28 = vadd.f32 %v2542_v59, %v1101_v53 }
 0x308   : > { %1688 = vmatpush.bf16.xpose.msra.mxu3 %v2568_v25 }
 0x309   : > { %v1616_v0 = vmax.f32 %v1454_v10, %v1552_v57  ;;  %v1173_v2 = vmul.f32 0.01, %v1102_v28 }
 0x30b   : > { %v1237_v48 = vmax.f32 %v1102_v28, %v1173_v2  ;;  %v1660_v49 = vpack.c.bf16 %v1616_v0, %v1615_v62 }
 0x30c   : > { %v1456_v5 = vpop.f32.mrf.mxu2 }
 0x30d   : > { %v1271_v51 = vpack.c.bf16 %v1237_v48, %v1236_v4  ;;  %v1457_v42 = vadd.f32 %v2611_v31, %v1456_v5 }
 0x30e   : > { %v1104_v9 = vpop.f32.mrf.mxu3 }
 0x30f   : > { %1495 = vmatmul.bf16.gmra.mxu3 %v1271_v51  ;;  %v1105_v54 = vadd.f32 %v2542_v59, %v1104_v9  ;;  %v1553_v7 = vmul.f32 0.01, %v1457_v42 }
 0x310   : > { %1689 = vmatpush.bf16.xpose.msra.mxu3 %v2558_v58 }
 0x311   : > { %v1174_v16 = vmul.f32 0.01, %v1105_v54  ;;  %v1617_v50 = vmax.f32 %v1457_v42, %v1553_v7 }
 0x313   : > { %v1238_v38 = vmax.f32 %v1105_v54, %v1174_v16 }
 0x314   : > { %v1458_v13 = vpop.f32.mrf.mxu2 }
 0x315   : > { %v1459_v41 = vadd.f32 %v2611_v31, %v1458_v13 }
 0x316   : > { %v1106_v15 = vpop.f32.mrf.mxu3 }
 0x317   : > { %v1107_v63 = vadd.f32 %v2542_v59, %v1106_v15  ;;  %v1554_v46 = vmul.f32 0.01, %v1459_v41 }
 0x318   : > { %1690 = vmatpush.bf16.xpose.msra.mxu3 %v2548_v30 }
 0x319   : > { %v1175_v25 = vmul.f32 0.01, %v1107_v63  ;;  %v1618_v47 = vmax.f32 %v1459_v41, %v1554_v46 }
 0x31b   : > { %v1239_v18 = vmax.f32 %v1107_v63, %v1175_v25  ;;  %v1661_v36 = vpack.c.bf16 %v1618_v47, %v1617_v50 }
 0x31c   : > { %v1461_v61 = vpop.f32.mrf.mxu2 }
 0x31d   : > { %v1272_v20 = vpack.c.bf16 %v1239_v18, %v1238_v38 }
 0x31e   : > { %v1109_v21 = vpop.f32.mrf.mxu3 }
 0x31f   : > { %1500 = vmatmul.bf16.gmra.mxu3 %v1272_v20  ;;  %v1110_v58 = vadd.f32 %v2542_v59, %v1109_v21 }
 0x320   : > { %1691 = vmatpush.bf16.xpose.msra.mxu3 %v2535_v56 }
 0x321   : > { %v1176_v23 = vmul.f32 0.01, %v1110_v58 }
 0x323   : > { %v1240_v30 = vmax.f32 %v1110_v58, %v1176_v23 }
 0x324   : > { %v1463_v22 = vpop.f32.mrf.mxu2 }
 0x325   : > { %v1464_v37 = vadd.f32 %v2611_v31, %v1463_v22 }
 0x326   : > { %v1111_v17 = vpop.f32.mrf.mxu3 }
 0x327   : > { %v1112_v11 = vadd.f32 %v2542_v59, %v1111_v17  ;;  %v1462_v59 = vadd.f32 %v2611_v31, %v1461_v61  ;;  %v1556_v3 = vmul.f32 0.01, %v1464_v37 }
 0x328   : > { %1692 = vmatpush.bf16.xpose.msra.mxu3 %v2521_v14  ;;  %v2641_v14 = vld [vmem:[%s2711_s7] sm:$0xf] }
 0x329   : > { %v1177_v32 = vmul.f32 0.01, %v1112_v11  ;;  %v1555_v26 = vmul.f32 0.01, %v1462_v59  ;;  %v1620_v6 = vmax.f32 %v1464_v37, %v1556_v3 }
 0x32b   : > { %v1241_v27 = vmax.f32 %v1112_v11, %v1177_v32  ;;  %v1619_v43 = vmax.f32 %v1462_v59, %v1555_v26 }
 0x32c   : > { %v1466_v29 = vpop.f32.mrf.mxu2 }
 0x32d   : > { %v1273_v8 = vpack.c.bf16 %v1241_v27, %v1240_v30  ;;  %v1467_v33 = vadd.f32 %v2611_v31, %v1466_v29  ;;  %v1662_v45 = vpack.c.bf16 %v1620_v6, %v1619_v43  ;;  %v1725_v43 = vstv %s1724_s27 }
 0x32f   : > { %1505 = vmatmul.bf16.gmra.mxu3 %v1273_v8  ;;  %v1557_v35 = vmul.f32 0.01, %v1467_v33 }
 0x331   : > { %v1621_v39 = vmax.f32 %v1467_v33, %v1557_v35 }
 0x334   : > { %v1468_v34 = vpop.f32.mrf.mxu2 }
 0x335   : > { %v1469_v56 = vadd.f32 %v2611_v31, %v1468_v34 }
 0x337   : > { %v1558_v1 = vmul.f32 0.01, %v1469_v56 }
 0x339   : > { %v1622_v19 = vmax.f32 %v1469_v56, %v1558_v1 }
 0x33b   : > { %v1663_v40 = vpack.c.bf16 %v1622_v19, %v1621_v39 }
 0x33c   : > { %v2656_v15 = vpop.f32.mrf.mxu2 }
 0x33f   : > { %1680 = vmatmul.bf16.vlgmr.msrb.gmra.mxu3 %v2641_v14 }
 0x340   : > { %1698 = vmatpush.bf16.xpose.msrb.mxu3 %v1663_v40 }
 0x344   : > { %v1473_v63 = vpop.f32.mrf.mxu2 }
 0x348   : > { %1699 = vmatpush.bf16.xpose.msrb.mxu3 %v1662_v45 }
 0x34c   : > { %v1476_v21 = vpop.f32.mrf.mxu2 }
 0x34f   : > { %1693 = vmatmul.bf16.vlgmr.msra.gmra.mxu3 %v2641_v14 }
 0x350   : > { %1700 = vmatpush.bf16.xpose.msrb.mxu3 %v1661_v36 }
 0x354   : > { %v1478_v33 = vpop.f32.mrf.mxu2 }
 0x358   : > { %1701 = vmatpush.bf16.xpose.msrb.mxu3 %v1660_v49 }
 0x35c   : > { %v1481_v39 = vpop.f32.mrf.mxu2 }
 0x35d   : > { %v1482_v42 = vadd.f32 %v2611_v31, %v1481_v39 }
 0x35f   : > { %v1563_v7 = vmul.f32 0.01, %v1482_v42 }
 0x360   : > { %1702 = vmatpush.bf16.xpose.msrb.mxu3 %v2618_v44 }
 0x364   : > { %v1483_v26 = vpop.f32.mrf.mxu2 }
 0x365   : > { %v1484_v6 = vadd.f32 %v2611_v31, %v1483_v26 }
 0x367   : > { %v1564_v45 = vmul.f32 0.01, %v1484_v6 }
 0x368   : > { %1703 = vmatpush.bf16.xpose.msrb.mxu3 %v2606_v24 }
 0x370   : > { %1704 = vmatpush.bf16.xpose.msrb.mxu3 %v2598_v60 }
 0x372   : > { %v1486_v52 = vpop.f32.mrf.mxu3 }
 0x373   : > { %v1487_v10 = vadd.f32 %v2611_v31, %v1486_v52  ;;  %v1479_v52 = vadd.f32 %v2611_v31, %v1478_v33 }
 0x375   : > { %v1565_v55 = vmul.f32 0.01, %v1487_v10 }
 0x377   : > { %v1629_v62 = vmax.f32 %v1487_v10, %v1565_v55  ;;  %v1628_v10 = vmax.f32 %v1484_v6, %v1564_v45  ;;  %v1477_v55 = vadd.f32 %v2611_v31, %v1476_v21 }
 0x378   : > { %1705 = vmatpush.bf16.xpose.msrb.mxu3 %v2592_v12 }
 0x37a   : > { %v1488_v53 = vpop.f32.mrf.mxu3 }
 0x37b   : > { %v1489_v57 = vadd.f32 %v2611_v31, %v1488_v53 }
 0x37d   : > { %v1566_v28 = vmul.f32 0.01, %v1489_v57 }
 0x37f   : > { %v1630_v0 = vmax.f32 %v1489_v57, %v1566_v28  ;;  %1706 = vmatmul.bf16.vlgmr.msrb.gmra.mxu3 %v2641_v14  ;;  %v1627_v57 = vmax.f32 %v1482_v42, %v1563_v7 }
 0x381   : > { %v1667_v2 = vpack.c.bf16 %v1630_v0, %v1629_v62  ;;  %v1562_v0 = vmul.f32 0.01, %v1479_v52 }
 0x382   : > { %v1491_v44 = vpop.f32.mrf.mxu3 }
 0x383   : > { %v1492_v24 = vadd.f32 %v2611_v31, %v1491_v44  ;;  %v1666_v44 = vpack.c.bf16 %v1628_v10, %v1627_v57 }
 0x385   : > { %v1567_v60 = vmul.f32 0.01, %v1492_v24 }
 0x387   : > { %v1631_v5 = vmax.f32 %v1492_v24, %v1567_v60 }
 0x38a   : > { %v1493_v4 = vpop.f32.mrf.mxu3 }
 0x38b   : > { %v1494_v48 = vadd.f32 %v2611_v31, %v1493_v4  ;;  %v1561_v4 = vmul.f32 0.01, %v1477_v55 }
 0x38d   : > { %v1568_v49 = vmul.f32 0.01, %v1494_v48 }
 0x38f   : > { %v1632_v12 = vmax.f32 %v1494_v48, %v1568_v49  ;;  %v1474_v48 = vadd.f32 %v2611_v31, %v1473_v63  ;;  %v1626_v49 = vmax.f32 %v1479_v52, %v1562_v0 }
 0x391   : > { %v1668_v51 = vpack.c.bf16 %v1632_v12, %v1631_v5  ;;  %v1472_v5 = vadd.f32 %v2611_v31, %v2656_v15  ;;  %v1625_v12 = vmax.f32 %v1477_v55, %v1561_v4 }
 0x392   : > { %v1496_v9 = vpop.f32.mrf.mxu3 }
 0x393   : > { %v1497_v34 = vadd.f32 %v2611_v31, %v1496_v9  ;;  %v1665_v9 = vpack.c.bf16 %v1626_v49, %v1625_v12 }
 0x395   : > { %v1569_v37 = vmul.f32 0.01, %v1497_v34 }
 0x397   : > { %v1633_v59 = vmax.f32 %v1497_v34, %v1569_v37 }
 0x39a   : > { %v1498_v54 = vpop.f32.mrf.mxu3 }
 0x39b   : > { %v1499_v29 = vadd.f32 %v2611_v31, %v1498_v54  ;;  %v1559_v54 = vmul.f32 0.01, %v1472_v5 }
 0x39d   : > { %v1570_v1 = vmul.f32 0.01, %v1499_v29 }
 0x39f   : > { %v1634_v19 = vmax.f32 %v1499_v29, %v1570_v1 }
 0x3a1   : > { %v1669_v3 = vpack.c.bf16 %v1634_v19, %v1633_v59 }
 0x3a2   : > { %v1501_v13 = vpop.f32.mrf.mxu3 }
 0x3a3   : > { %v1502_v17 = vadd.f32 %v2611_v31, %v1501_v13 }
 0x3a5   : > { %v1571_v27 = vmul.f32 0.01, %v1502_v17 }
 0x3a7   : > { %v1635_v56 = vmax.f32 %v1502_v17, %v1571_v27 }
 0x3aa   : > { %v1503_v16 = vpop.f32.mrf.mxu3 }
 0x3ab   : > { %v1504_v58 = vadd.f32 %v2611_v31, %v1503_v16  ;;  %v1623_v16 = vmax.f32 %v1472_v5, %v1559_v54 }
 0x3ad   : > { %v1572_v32 = vmul.f32 0.01, %v1504_v58 }
 0x3af   : > { %v1636_v8 = vmax.f32 %v1504_v58, %v1572_v32  ;;  %v1752_v58 = vlaneseq }
 0x3b1   : > { %v1670_v35 = vpack.c.bf16 %v1636_v8, %v1635_v56  ;;  %vm1754_vm4 = vcmp.lt.s32.totalorder %v1752_v58, 512 }
 0x3b2   : > { %v1506_v25 = vpop.f32.mrf.mxu3 }
 0x3b3   : > { %v1507_v38 = vadd.f32 %v2611_v31, %v1506_v25 }
 0x3b5   : > { %v1573_v61 = vmul.f32 0.01, %v1507_v38 }
 0x3b7   : > { %v1637_v23 = vmax.f32 %v1507_v38, %v1573_v61 }
 0x3ba   : > { %v1508_v18 = vpop.f32.mrf.mxu3 }
 0x3bb   : > { %v1509_v20 = vadd.f32 %v2611_v31, %v1508_v18 }
 0x3bd   : > { %v1574_v22 = vmul.f32 0.01, %v1509_v20 }
 0x3bf   : > { %v1638_v11 = vmax.f32 %v1509_v20, %v1574_v22 }
 0x3c1   : > { %v1671_v30 = vpack.c.bf16 %v1638_v11, %v1637_v23 }
 0x3c2   : > { %v1681_v40 = vpop.f32.mrf.mxu3 }
 0x3c3   : > { %1711 = vmatpush.bf16.xpose.msra.mxu3 %v1671_v30  ;;  %v1726_v46 = vadd.f32 %v1725_v43, %v1681_v40 }
 0x3c5   : > { %v1730_v50 = vmul.f32 0.01, %v1726_v46 }
 0x3c7   : > { %v1734_v28 = vmax.f32 %v1726_v46, %v1730_v50 }
 0x3ca   : > { %v1683_v41 = vpop.f32.mrf.mxu3 }
 0x3cb   : > { %1712 = vmatpush.bf16.xpose.msra.mxu3 %v1670_v35 }
 0x3d2   : > { %v1694_v47 = vpop.f32.mrf.mxu3 }
 0x3d3   : > { %1713 = vmatpush.bf16.xpose.msra.mxu3 %v1669_v3  ;;  %v1727_v36 = vadd.f32 %v1725_v43, %v1694_v47 }
 0x3d5   : > { %v1731_v53 = vmul.f32 0.01, %v1727_v36 }
 0x3d7   : > { %v1735_v62 = vmax.f32 %v1727_v36, %v1731_v53 }
 0x3d9   : > { %v1742_v24 = vrot.slane %v1735_v62, 7 }
 0x3da   : > { %v1696_v60 = vpop.f32.mrf.mxu3 }
 0x3db   : > { %1714 = vmatpush.bf16.xpose.msra.mxu3 %v1668_v51  ;;  %v1560_v51 = vmul.f32 0.01, %v1474_v48 }
 0x3dd   : > { %v1624_v13 = vmax.f32 %v1474_v48, %v1560_v51 }
 0x3df   : > { %v1664_v25 = vpack.c.bf16 %v1624_v13, %v1623_v16 }
 0x3e3   : > { %1715 = vmatpush.bf16.xpose.msra.mxu3 %v1667_v2  ;;  %v1746_v2 = vsel %vm1745_vm1, %v1734_v28, %v1742_v24 }
 0x3eb   : > { %1716 = vmatpush.bf16.xpose.msra.mxu3 %v1666_v44 }
 0x3f3   : > { %1717 = vmatpush.bf16.xpose.msra.mxu3 %v1665_v9 }
 0x3fb   : > { %1718 = vmatpush.bf16.xpose.msra.mxu3 %v1664_v25 }
 0x402   : > { %1719 = vmatmul.bf16.vlgmr.msra.gmra.mxu3 %v2641_v14  ;;  %v1707_v38 = vpop.f32.mrf.mxu3 }
 0x403   : > { %v1728_v63 = vadd.f32 %v1725_v43, %v1707_v38 }
 0x405   : > { %v1732_v61 = vmul.f32 0.01, %v1728_v63 }
 0x407   : > { %v1736_v15 = vmax.f32 %v1728_v63, %v1732_v61 }
 0x409   : > { %v1743_v14 = vrot.slane %v1736_v15, 6 }
 0x40a   : > { %v1709_v18 = vpop.f32.mrf.mxu3 }
 0x485   : > { %v1720_v20 = vpop.f32.mrf.mxu3 }
 0x486   : > { %v1729_v31 = vadd.f32 %v1725_v43, %v1720_v20 }
 0x488   : > { %v1733_v21 = vmul.f32 0.01, %v1729_v31 }
 0x48a   : > { %v1737_v22 = vmax.f32 %v1729_v31, %v1733_v21 }
 0x48c   : > { %v1744_v17 = vrot.slane %v1737_v22, 5 }
 0x48d   : > { %v1722_v23 = vpop.f32.mrf.mxu3 }
 0x48e   : > { %v1748_v11 = vsel %vm1747_vm2, %v1743_v14, %v1744_v17 }
 0x48f   : > { %v1750_v32 = vsel %vm1749_vm3, %v1746_v2, %v1748_v11 }
 0x490   : > { %1756 = vst.msk [vmem:[%s327_s18] sm:$0xf] %vm1754_vm4, %v1750_v32 }
 0x491   : > { %2055 = shalt.err (!%p2052_p3)
}
 0x492   : > { %1983 = dma.vmem_to_hbm [thread:$0]  (%p2183_p5), %s1771_s22, 64, %s1773_s23, %s1758_s8  }
 0x493 PF: > { %p1989_p4 = scmp.ge.s32.totalorder %s2090_s14, 2  ;;  %s1784_s28 = sand.u32 1, %s2078_s11  }
 0x494   : > { %s1785_s30 = scalar_lea.sflag [#allocation4], %s1784_s28 }
 0x495   : > { %p1986_p7 = pnand %p1989_p4, %p2187_p6 }
 0x497   : > { %p1987_p8 = pneg %p1986_p7 }
 0x499   : > { %2073 = dma.done.wait (%p1987_p8), %s1785_s30, 64  }
 0x49a   : > { %2075 = vsyncadd (%p1987_p8), %s1785_s30, 4294967232  ;;  %p20_p9 = scmp.ge.s32.totalorder %s2170_s16, 4   ;;  %s2716_s11 = smov %s2082_s12 }
 0x49b   : > { %s2717_s12 = smov %s2086_s13  ;;  %s2718_s13 = smov %s2181_s19 }
 0x49c   : > { %s2719_s14 = smov %s2170_s16  ;;  %22 = sbr.rel (!%p20_p9) target bundleno = 5 (0x5), region = 91 }
 0x4a1   :  { %1791 = vsyncpa [#allocation4], 1 }
 0x4a2   :  { %1793 = vsyncpa [#allocation4 + $0x1], 1 }

</bundles_post_ra>
